<compile_context>
chip_gen: v5e
topology: v5e:2x2
jax: 0.10.0
libtpu: 0.0.40
codegen_flags: <defaults>
</compile_context>

<pallas_src>
import math

import jax
import jax.numpy as jnp
from jax import lax
from jax.experimental import pallas as pl
from jax.experimental.pallas import tpu as pltpu

# ---------------- problem sizes ----------------
QUERY_DIM = 8            # query_dim (= Lk, required by the final matmul)
KEY_DIM   = 8            # key_dim
NUM_VALUE = 2            # num_value
LQ = 8                   # query rows per instance
LK = 8                   # key rows per instance
LV = 8                   # value rows per instance (required by .view(Lq, query_dim, -1))
B     = 128              # batched problem instances per call
B_BLK = 16               # instances processed per grid step  (grid = B // B_BLK)
INV_SCALAR = 1.0 / math.sqrt(QUERY_DIM)

W_COLS = KEY_DIM + KEY_DIM + QUERY_DIM * NUM_VALUE   # 32 packed weight/bias columns


# ---------------- fused kernel (one grid step = B_BLK instances) ----------------
def fused_attention_kernel(qkv_ref, ws_ref, bs_ref, o_ref):
    # qkv_ref: (3, B_BLK*LQ, D)   plane 0 = query rows, 1 = key rows, 2 = value rows
    # ws_ref:  (D, 32)            [Wq^T*inv | Wk^T | column-grouped Wv^T]
    # bs_ref:  (1, 32)            [bq*inv   | bk   | column-grouped bv  ]
    # o_ref:   (B_BLK, NUM_VALUE, LQ, LV)   o[b, x, i, a] = out[b, a, i, x]
    rows = B_BLK * LQ

    # Single combined projection for q, k and v against the packed weight slab.
    all_in = qkv_ref[...].reshape(3 * rows, QUERY_DIM)
    proj = jnp.dot(all_in, ws_ref[...],
                   preferred_element_type=jnp.float32) + bs_ref[...]

    qp = proj[0 * rows:1 * rows, 0:KEY_DIM].reshape(B_BLK, LQ, KEY_DIM)
    kp = proj[1 * rows:2 * rows, KEY_DIM:2 * KEY_DIM].reshape(B_BLK, LK, KEY_DIM)
    vg = proj[2 * rows:3 * rows, 2 * KEY_DIM:W_COLS].reshape(
        B_BLK, LV, NUM_VALUE * QUERY_DIM)

    # Scaled scores (1/sqrt(d) already folded into Wq/bq) + stable softmax.
    s = jnp.einsum('bid,bjd->bij', qp, kp, preferred_element_type=jnp.float32)
    m = jnp.max(s, axis=-1, keepdims=True)
    e = jnp.exp(s - m)
    p = e / jnp.sum(e, axis=-1, keepdims=True)
    # TODO(synk): torch.nn.Dropout(p=0.5) is stochastic in train mode; implemented as
    #             eval-mode identity (deterministic inference semantics).

    # Final contraction, one batched matmul per value slice, stored directly into
    # sublane-aligned sub-refs of the output block (no lane-axis concatenate).
    for x in range(NUM_VALUE):                       # static unroll (NUM_VALUE = 2)
        vx = vg[:, :, x * QUERY_DIM:(x + 1) * QUERY_DIM]   # v_view[..., x]
        o_ref[:, x, :, :] = jnp.einsum('bik,bak->bia', p, vx,
                                       preferred_element_type=jnp.float32)


# ---------------- wrapper ----------------
@jax.jit
def model_forward(query, key, value, ws, bs):
    # query/key/value: (B, 8, 8);  ws: (8, 32);  bs: (1, 32)
    b = query.shape[0]
    qkv = jnp.stack([query.reshape(b * LQ, QUERY_DIM),
                     key.reshape(b * LK, QUERY_DIM),
                     value.reshape(b * LV, QUERY_DIM)], axis=0)      # (3, b*8, 8)

    out = pl.pallas_call(
        fused_attention_kernel,
        grid=(b // B_BLK,),
        in_specs=[
            pl.BlockSpec((3, B_BLK * LQ, QUERY_DIM), lambda i: (0, i, 0)),
            pl.BlockSpec((QUERY_DIM, W_COLS), lambda i: (0, 0)),
            pl.BlockSpec((1, W_COLS), lambda i: (0, 0)),
        ],
        out_specs=pl.BlockSpec((B_BLK, NUM_VALUE, LQ, LV), lambda i: (i, 0, 0, 0)),
        out_shape=jax.ShapeDtypeStruct((b, NUM_VALUE, LQ, LV), jnp.float32),
        compiler_params=pltpu.CompilerParams(
            dimension_semantics=("parallel",)),
    )(qkv, ws, bs)

    # out[b, x, i, a]  ->  (b, a, i, x)   (torch layout per instance is [a, i, x])
    return out.transpose(0, 3, 2, 1)


# ---------------- parameter packing ----------------
def pack_params(wq, bq, wk, bk, wv, bv):
    """Pack all projection weights into one (D, 32) slab, biases into one (1, 32) slab."""
    # Column-grouped Wv^T / bv so that (v @ wvg)[:, x*D + k] == v_view[:, k, x].
    perm = jnp.array([kk * NUM_VALUE + x
                      for x in range(NUM_VALUE) for kk in range(QUERY_DIM)],
                     dtype=jnp.int32)
    wvg = wv.T[:, perm]
    bvg = bv[perm]
    ws = jnp.concatenate([wq.T * INV_SCALAR, wk.T, wvg], axis=1)          # (D, 32)
    bs = jnp.concatenate([bq * INV_SCALAR, bk, bvg]).reshape(1, W_COLS)   # (1, 32)
    return ws, bs


# ---------------- pure-JAX reference (unpacked params) ----------------
def reference_forward(query, key, value, wq, bq, wk, bk, wv, bv):
    hi = lax.Precision.HIGHEST
    qp = jnp.einsum('bld,kd->blk', query, wq, precision=hi) + bq
    kp = jnp.einsum('bld,kd->blk', key, wk, precision=hi) + bk
    s = jnp.einsum('bik,bjk->bij', qp, kp, precision=hi) * INV_SCALAR
    p = jax.nn.softmax(s, axis=-1)
    vp = jnp.einsum('bld,md->blm', value, wv, precision=hi) + bv
    v_view = vp.reshape(-1, LV, QUERY_DIM, NUM_VALUE)
    return jnp.einsum('bik,bakx->baix', p, v_view, precision=hi)


def init_linear(rng, out_features, in_features):
    """PyTorch-style Linear init: U(-1/sqrt(in), 1/sqrt(in)) for W and b."""
    kw, kb = jax.random.split(rng)
    bound = 1.0 / math.sqrt(in_features)
    w = jax.random.uniform(kw, (out_features, in_features), jnp.float32, -bound, bound)
    b = jax.random.uniform(kb, (out_features,), jnp.float32, -bound, bound)
    return w, b


if __name__ == "__main__":
    root = jax.random.PRNGKey(0)
    k_q, k_k, k_v, k_p1, k_p2, k_p3 = jax.random.split(root, 6)

    query = jax.random.normal(k_q, (B, LQ, QUERY_DIM), jnp.float32)
    key   = jax.random.normal(k_k, (B, LK, QUERY_DIM), jnp.float32)
    value = jax.random.normal(k_v, (B, LV, QUERY_DIM), jnp.float32)

    wq, bq = init_linear(k_p1, KEY_DIM, QUERY_DIM)
    wk, bk = init_linear(k_p2, KEY_DIM, QUERY_DIM)
    wv, bv = init_linear(k_p3, QUERY_DIM * NUM_VALUE, QUERY_DIM)

    ws, bs = pack_params(wq, bq, wk, bk, wv, bv)

    out = model_forward(query, key, value, ws, bs)
    out = jax.block_until_ready(out)

    ref = reference_forward(query, key, value, wq, bq, wk, bk, wv, bv)

    assert out.shape == (B, LV, LQ, NUM_VALUE)
    assert jnp.allclose(out, ref, atol=2e-5, rtol=2e-5), "mismatch vs. JAX reference"

    print("KERNEL_OK")
</pallas_src>

<mosaic_0001>
module attributes {stable_mosaic.version = 11 : i64} {
  func.func @fused_attention_kernel(%arg0: i32, %arg1: memref<3x128x8xf32, #tpu.memory_space<vmem>>, %arg2: memref<8x32xf32, #tpu.memory_space<vmem>>, %arg3: memref<1x32xf32, #tpu.memory_space<vmem>>, %arg4: memref<16x2x8x8xf32, #tpu.memory_space<vmem>>) attributes {dimension_semantics = [#tpu.dimension_semantics<parallel>], iteration_bounds = array<i64: 8>, scalar_prefetch = 0 : i64, scratch_operands = 0 : i64, tpu.core_type = #tpu.core_type<tc>, window_params = [{transform_indices = @transform_0, window_bounds = array<i64: 3, 128, 8>}, {pipeline_mode = #tpu.pipeline_mode<synchronous>, transform_indices = @transform_1, window_bounds = array<i64: 8, 32>}, {pipeline_mode = #tpu.pipeline_mode<synchronous>, transform_indices = @transform_2, window_bounds = array<i64: 1, 32>}, {transform_indices = @transform_3, window_bounds = array<i64: 16, 2, 8, 8>}]} {
    %c0 = arith.constant 0 : index
    %c0_0 = arith.constant 0 : index
    %c0_1 = arith.constant 0 : index
    %0 = vector.load %arg1[%c0, %c0_0, %c0_1] : memref<3x128x8xf32, #tpu.memory_space<vmem>>, vector<3x128x8xf32>
    %1 = vector.shape_cast %0 : vector<3x128x8xf32> to vector<384x8xf32>
    %c0_2 = arith.constant 0 : index
    %c0_3 = arith.constant 0 : index
    %2 = vector.load %arg2[%c0_2, %c0_3] : memref<8x32xf32, #tpu.memory_space<vmem>>, vector<8x32xf32>
    %cst = arith.constant dense<0.000000e+00> : vector<384x32xf32>
    %3 = tpu.matmul %1, %2, %cst {dimension_numbers = #tpu.dot_dimension_numbers<[1], [0], [0], [1], [0, 0, 1, 1], [], []>} : vector<384x8xf32>, vector<8x32xf32>, vector<384x32xf32> -> vector<384x32xf32>
    %c0_4 = arith.constant 0 : index
    %c0_5 = arith.constant 0 : index
    %4 = vector.load %arg3[%c0_4, %c0_5] : memref<1x32xf32, #tpu.memory_space<vmem>>, vector<1x32xf32>
    %5 = vector.broadcast %4 : vector<1x32xf32> to vector<384x32xf32>
    %6 = arith.addf %3, %5 : vector<384x32xf32>
    %7 = vector.extract_strided_slice %6 {offsets = [0, 0], sizes = [128, 8], strides = [1, 1]} : vector<384x32xf32> to vector<128x8xf32>
    %8 = vector.shape_cast %7 : vector<128x8xf32> to vector<16x8x8xf32>
    %9 = vector.extract_strided_slice %6 {offsets = [128, 8], sizes = [128, 8], strides = [1, 1]} : vector<384x32xf32> to vector<128x8xf32>
    %10 = vector.shape_cast %9 : vector<128x8xf32> to vector<16x8x8xf32>
    %11 = vector.extract_strided_slice %6 {offsets = [256, 16], sizes = [128, 16], strides = [1, 1]} : vector<384x32xf32> to vector<128x16xf32>
    %12 = vector.shape_cast %11 : vector<128x16xf32> to vector<16x8x16xf32>
    "tpu.trace_start"() <{level = 10 : i32, message = "bid,bjd->bij"}> : () -> ()
    %cst_6 = arith.constant dense<0.000000e+00> : vector<16x8x8xf32>
    %13 = tpu.matmul %8, %10, %cst_6 {dimension_numbers = #tpu.dot_dimension_numbers<[2], [2], [1], [1], [0, 0, 0, 1, 1, 1], [0], [0]>} : vector<16x8x8xf32>, vector<16x8x8xf32>, vector<16x8x8xf32> -> vector<16x8x8xf32>
    "tpu.trace_stop"() : () -> ()
    %cst_7 = arith.constant dense<0xFF800000> : vector<16x8xf32>
    %14 = vector.multi_reduction <maximumf>, %13, %cst_7 [2] : vector<16x8x8xf32> to vector<16x8xf32>
    %15 = vector.shape_cast %14 : vector<16x8xf32> to vector<16x8x1xf32>
    %16 = vector.broadcast %15 : vector<16x8x1xf32> to vector<16x8x8xf32>
    %17 = arith.subf %13, %16 : vector<16x8x8xf32>
    %18 = math.exp %17 : vector<16x8x8xf32>
    %cst_8 = arith.constant dense<0.000000e+00> : vector<16x8xf32>
    %19 = vector.multi_reduction <add>, %18, %cst_8 [2] : vector<16x8x8xf32> to vector<16x8xf32>
    %20 = vector.shape_cast %19 : vector<16x8xf32> to vector<16x8x1xf32>
    %21 = vector.broadcast %20 : vector<16x8x1xf32> to vector<16x8x8xf32>
    %22 = arith.divf %18, %21 : vector<16x8x8xf32>
    %23 = vector.extract_strided_slice %12 {offsets = [0, 0, 0], sizes = [16, 8, 8], strides = [1, 1, 1]} : vector<16x8x16xf32> to vector<16x8x8xf32>
    "tpu.trace_start"() <{level = 10 : i32, message = "bik,bak->bia"}> : () -> ()
    %cst_9 = arith.constant dense<0.000000e+00> : vector<16x8x8xf32>
    %24 = tpu.matmul %22, %23, %cst_9 {dimension_numbers = #tpu.dot_dimension_numbers<[2], [2], [1], [1], [0, 0, 0, 1, 1, 1], [0], [0]>} : vector<16x8x8xf32>, vector<16x8x8xf32>, vector<16x8x8xf32> -> vector<16x8x8xf32>
    "tpu.trace_stop"() : () -> ()
    %c0_10 = arith.constant 0 : index
    %c0_11 = arith.constant 0 : index
    %c0_12 = arith.constant 0 : index
    %c0_13 = arith.constant 0 : index
    %25 = vector.load %arg4[%c0_10, %c0_11, %c0_12, %c0_13] : memref<16x2x8x8xf32, #tpu.memory_space<vmem>>, vector<16x1x8x8xf32>
    %26 = vector.shape_cast %25 : vector<16x1x8x8xf32> to vector<16x8x8xf32>
    %27 = vector.shape_cast %24 : vector<16x8x8xf32> to vector<16x1x8x8xf32>
    tpu.vector_store %arg4[%c0_10, %c0_11, %c0_12, %c0_13], %27 {strides = array<i32>} : memref<16x2x8x8xf32, #tpu.memory_space<vmem>>, vector<16x1x8x8xf32>,
    %28 = vector.extract_strided_slice %12 {offsets = [0, 0, 8], sizes = [16, 8, 8], strides = [1, 1, 1]} : vector<16x8x16xf32> to vector<16x8x8xf32>
    "tpu.trace_start"() <{level = 10 : i32, message = "bik,bak->bia"}> : () -> ()
    %cst_14 = arith.constant dense<0.000000e+00> : vector<16x8x8xf32>
    %29 = tpu.matmul %22, %28, %cst_14 {dimension_numbers = #tpu.dot_dimension_numbers<[2], [2], [1], [1], [0, 0, 0, 1, 1, 1], [0], [0]>} : vector<16x8x8xf32>, vector<16x8x8xf32>, vector<16x8x8xf32> -> vector<16x8x8xf32>
    "tpu.trace_stop"() : () -> ()
    %c0_15 = arith.constant 0 : index
    %c1 = arith.constant 1 : index
    %c0_16 = arith.constant 0 : index
    %c0_17 = arith.constant 0 : index
    %30 = vector.load %arg4[%c0_15, %c1, %c0_16, %c0_17] : memref<16x2x8x8xf32, #tpu.memory_space<vmem>>, vector<16x1x8x8xf32>
    %31 = vector.shape_cast %30 : vector<16x1x8x8xf32> to vector<16x8x8xf32>
    %32 = vector.shape_cast %29 : vector<16x8x8xf32> to vector<16x1x8x8xf32>
    tpu.vector_store %arg4[%c0_15, %c1, %c0_16, %c0_17], %32 {strides = array<i32>} : memref<16x2x8x8xf32, #tpu.memory_space<vmem>>, vector<16x1x8x8xf32>,
    return
  }
  func.func @transform_0(%arg0: i32) -> (i32, i32, i32) {
    %c0_i32 = arith.constant 0 : i32
    %c0_i32_0 = arith.constant 0 : i32
    %c0_i32_1 = arith.constant 0 : i32
    return %c0_i32, %arg0, %c0_i32_0 : i32, i32, i32
  }
  func.func @transform_1(%arg0: i32) -> (i32, i32) {
    %c0_i32 = arith.constant 0 : i32
    %c0_i32_0 = arith.constant 0 : i32
    %c0_i32_1 = arith.constant 0 : i32
    return %c0_i32, %c0_i32_0 : i32, i32
  }
  func.func @transform_2(%arg0: i32) -> (i32, i32) {
    %c0_i32 = arith.constant 0 : i32
    %c0_i32_0 = arith.constant 0 : i32
    %c0_i32_1 = arith.constant 0 : i32
    return %c0_i32, %c0_i32_0 : i32, i32
  }
  func.func @transform_3(%arg0: i32) -> (i32, i32, i32, i32) {
    %c0_i32 = arith.constant 0 : i32
    %c0_i32_0 = arith.constant 0 : i32
    %c0_i32_1 = arith.constant 0 : i32
    %c0_i32_2 = arith.constant 0 : i32
    return %arg0, %c0_i32, %c0_i32_0, %c0_i32_1 : i32, i32, i32, i32
  }
}

</mosaic_0001>

<bundles_post_ra>
// kernel: model_forward.1
= control target key start
LH: loop header
LB: loop body
LE: loop exit
PB: predicated region body
PF: predicated region fallthrough
CT: control target
= control target key end

     0   :  { %s2837_s12 = smov 0   ;;  %s2839_s13 = smov 0   ;;  %s3789_s0 = inlined_call_operand.vmem [shape: f32[3,1024,8], index: 0, kind: input, shape index: {}]   ;;  %s3790_s1 = inlined_call_operand.vmem [shape: f32[8,32], index: 1, kind: input, shape index: {}]   ;;  %s3791_s2 = inlined_call_operand.vmem [shape: f32[1,32], index: 2, kind: input, shape index: {}]   ;;  %s3792_s3 = inlined_call_operand.vmem [shape: f32[128,2,8,8], index: 3, kind: output, shape index: {}]  }
   0x1   :  { %s2841_s14 = smov 0  }
   0x2 LB: > { %s2519_s15 = sadd.s32 4294967295, %s2812_s14   ;;  %s2854_s16 = sadd.s32 1, %s2812_s14   ;;  %s2812_s14 = sphi %s2841_s14, %s3799_s14   ;;  %s2808_s13 = sphi %s2839_s13, %s3798_s13   ;;  %s2804_s12 = sphi %s2837_s12, %s3797_s12  }
   0x3   : > { %s17_s17 = ssub.s32 %s2812_s14, %s2854_s16  ;;  %s20_s18 = sadd.s32 1, %s2808_s13 }
   0x4   : > { %p18_p0 = scmp.eq.s32.totalorder %s17_s17, 0  ;;  %p27_p1 = scmp.ne.s32.totalorder %s2808_s13, %s2804_s12 }
   0x5   : > { %p28_p2 = scmp.eq.s32.totalorder %s2812_s14, 0  ;;  %p2522_p4 = scmp.ge.s32.totalorder %s2812_s14, 8 }
   0x6   : > { %s2863_s19 = scalar_select %p18_p0, %s2808_s13, %s20_s18  }
   0x7   : > { %p29_p3 = por %p28_p2, %p27_p1  ;;  %127 = sbr.rel (%p2522_p4) target bundleno = 64 (0x40), region = 24 }
   0xc   : > { %130 = sbr.rel (!%p29_p3) target bundleno = 64 (0x40), region = 28  ;;  %s132_s20 = sand.u32 (%p29_p3), 1, %s2808_s13  }
   0xd   : > { %s2691_s21 = sshll.u32 (%p29_p3), %s2812_s14, 7  ;;  %s2696_s22 = smul.u32 (%p29_p3), 384, %s132_s20 }
   0xe   : > { %s2871_s25 = scalar_lea.vmem (%p29_p3), %s3789_s0, %s2691_s21 }
   0xf   : > { %v260_v0 = vld [vmem:[%s2871_s25] sm:$0xff] (%p29_p3)  ;;  %v262_v1 = vld [vmem:[%s2871_s25 + $0x8] sm:$0xff] (%p29_p3)  ;;  %v264_v2 = vld [vmem:[%s2871_s25 + $0x10] sm:$0xff] (%p29_p3)  ;;  %s2876_s26 = scalar_lea.vmem (%p29_p3), [#allocation2], %s2696_s22 }
  0x10   : > { %261 = vst [vmem:[%s2876_s26] sm:$0xff] (%p29_p3), %v260_v0  ;;  %v266_v3 = vld [vmem:[%s2871_s25 + $0x18] sm:$0xff] (%p29_p3)  ;;  %v268_v4 = vld [vmem:[%s2871_s25 + $0x20] sm:$0xff] (%p29_p3)  ;;  %v270_v5 = vld [vmem:[%s2871_s25 + $0x28] sm:$0xff] (%p29_p3) }
  0x11   : > { %263 = vst [vmem:[%s2876_s26 + $0x8] sm:$0xff] %v262_v1  ;;  %v272_v6 = vld [vmem:[%s2871_s25 + $0x30] sm:$0xff]  ;;  %v274_v7 = vld [vmem:[%s2871_s25 + $0x38] sm:$0xff]  ;;  %v276_v8 = vld [vmem:[%s2871_s25 + $0x40] sm:$0xff] }
  0x12   : > { %265 = vst [vmem:[%s2876_s26 + $0x10] sm:$0xff] %v264_v2  ;;  %v278_v9 = vld [vmem:[%s2871_s25 + $0x48] sm:$0xff]  ;;  %v280_v10 = vld [vmem:[%s2871_s25 + $0x50] sm:$0xff]  ;;  %v282_v11 = vld [vmem:[%s2871_s25 + $0x58] sm:$0xff] }
  0x13   : > { %267 = vst [vmem:[%s2876_s26 + $0x18] sm:$0xff] %v266_v3  ;;  %v284_v12 = vld [vmem:[%s2871_s25 + $0x60] sm:$0xff]  ;;  %v286_v13 = vld [vmem:[%s2871_s25 + $0x68] sm:$0xff]  ;;  %v288_v14 = vld [vmem:[%s2871_s25 + $0x70] sm:$0xff] }
  0x14   : > { %269 = vst [vmem:[%s2876_s26 + $0x20] sm:$0xff] %v268_v4  ;;  %v290_v15 = vld [vmem:[%s2871_s25 + $0x78] sm:$0xff]  ;;  %v292_v16 = vld [vmem:[%s2871_s25 + $0x400] sm:$0xff]  ;;  %v294_v17 = vld [vmem:[%s2871_s25 + $0x408] sm:$0xff] }
  0x15   : > { %271 = vst [vmem:[%s2876_s26 + $0x28] sm:$0xff] %v270_v5  ;;  %v296_v18 = vld [vmem:[%s2871_s25 + $0x410] sm:$0xff]  ;;  %v298_v19 = vld [vmem:[%s2871_s25 + $0x418] sm:$0xff]  ;;  %v300_v20 = vld [vmem:[%s2871_s25 + $0x420] sm:$0xff] }
  0x16   : > { %273 = vst [vmem:[%s2876_s26 + $0x30] sm:$0xff] %v272_v6  ;;  %v302_v21 = vld [vmem:[%s2871_s25 + $0x428] sm:$0xff]  ;;  %v304_v22 = vld [vmem:[%s2871_s25 + $0x430] sm:$0xff]  ;;  %v306_v23 = vld [vmem:[%s2871_s25 + $0x438] sm:$0xff] }
  0x17   : > { %275 = vst [vmem:[%s2876_s26 + $0x38] sm:$0xff] %v274_v7  ;;  %v308_v24 = vld [vmem:[%s2871_s25 + $0x440] sm:$0xff]  ;;  %v310_v25 = vld [vmem:[%s2871_s25 + $0x448] sm:$0xff]  ;;  %v312_v26 = vld [vmem:[%s2871_s25 + $0x450] sm:$0xff] }
  0x18   : > { %277 = vst [vmem:[%s2876_s26 + $0x40] sm:$0xff] %v276_v8  ;;  %v314_v27 = vld [vmem:[%s2871_s25 + $0x458] sm:$0xff]  ;;  %v316_v28 = vld [vmem:[%s2871_s25 + $0x460] sm:$0xff]  ;;  %v318_v29 = vld [vmem:[%s2871_s25 + $0x468] sm:$0xff] }
  0x19   : > { %279 = vst [vmem:[%s2876_s26 + $0x48] sm:$0xff] %v278_v9  ;;  %v320_v30 = vld [vmem:[%s2871_s25 + $0x470] sm:$0xff]  ;;  %v322_v31 = vld [vmem:[%s2871_s25 + $0x478] sm:$0xff]  ;;  %v324_v32 = vld [vmem:[%s2871_s25 + $0x800] sm:$0xff] }
  0x1a   : > { %281 = vst [vmem:[%s2876_s26 + $0x50] sm:$0xff] %v280_v10  ;;  %v326_v33 = vld [vmem:[%s2871_s25 + $0x808] sm:$0xff]  ;;  %v328_v34 = vld [vmem:[%s2871_s25 + $0x810] sm:$0xff]  ;;  %v330_v35 = vld [vmem:[%s2871_s25 + $0x818] sm:$0xff] }
  0x1b   : > { %283 = vst [vmem:[%s2876_s26 + $0x58] sm:$0xff] %v282_v11  ;;  %v332_v36 = vld [vmem:[%s2871_s25 + $0x820] sm:$0xff]  ;;  %v334_v37 = vld [vmem:[%s2871_s25 + $0x828] sm:$0xff]  ;;  %v336_v38 = vld [vmem:[%s2871_s25 + $0x830] sm:$0xff] }
  0x1c   : > { %285 = vst [vmem:[%s2876_s26 + $0x60] sm:$0xff] %v284_v12  ;;  %v338_v39 = vld [vmem:[%s2871_s25 + $0x838] sm:$0xff]  ;;  %v340_v40 = vld [vmem:[%s2871_s25 + $0x840] sm:$0xff]  ;;  %v342_v41 = vld [vmem:[%s2871_s25 + $0x848] sm:$0xff] }
  0x1d   : > { %287 = vst [vmem:[%s2876_s26 + $0x68] sm:$0xff] %v286_v13  ;;  %v344_v42 = vld [vmem:[%s2871_s25 + $0x850] sm:$0xff]  ;;  %v346_v43 = vld [vmem:[%s2871_s25 + $0x858] sm:$0xff]  ;;  %v348_v44 = vld [vmem:[%s2871_s25 + $0x860] sm:$0xff] }
  0x1e   : > { %289 = vst [vmem:[%s2876_s26 + $0x70] sm:$0xff] %v288_v14  ;;  %v350_v45 = vld [vmem:[%s2871_s25 + $0x868] sm:$0xff]  ;;  %v352_v46 = vld [vmem:[%s2871_s25 + $0x870] sm:$0xff]  ;;  %v354_v47 = vld [vmem:[%s2871_s25 + $0x878] sm:$0xff] }
  0x1f   : > { %291 = vst [vmem:[%s2876_s26 + $0x78] sm:$0xff] %v290_v15 }
  0x20   : > { %293 = vst [vmem:[%s2876_s26 + $0x80] sm:$0xff] %v292_v16 }
  0x21   : > { %295 = vst [vmem:[%s2876_s26 + $0x88] sm:$0xff] %v294_v17 }
  0x22   : > { %297 = vst [vmem:[%s2876_s26 + $0x90] sm:$0xff] %v296_v18 }
  0x23   : > { %299 = vst [vmem:[%s2876_s26 + $0x98] sm:$0xff] %v298_v19 }
  0x24   : > { %301 = vst [vmem:[%s2876_s26 + $0xa0] sm:$0xff] %v300_v20 }
  0x25   : > { %303 = vst [vmem:[%s2876_s26 + $0xa8] sm:$0xff] %v302_v21 }
  0x26   : > { %305 = vst [vmem:[%s2876_s26 + $0xb0] sm:$0xff] %v304_v22 }
  0x27   : > { %307 = vst [vmem:[%s2876_s26 + $0xb8] sm:$0xff] %v306_v23 }
  0x28   : > { %309 = vst [vmem:[%s2876_s26 + $0xc0] sm:$0xff] %v308_v24 }
  0x29   : > { %311 = vst [vmem:[%s2876_s26 + $0xc8] sm:$0xff] %v310_v25 }
  0x2a   : > { %313 = vst [vmem:[%s2876_s26 + $0xd0] sm:$0xff] %v312_v26 }
  0x2b   : > { %315 = vst [vmem:[%s2876_s26 + $0xd8] sm:$0xff] %v314_v27 }
  0x2c   : > { %317 = vst [vmem:[%s2876_s26 + $0xe0] sm:$0xff] %v316_v28 }
  0x2d   : > { %319 = vst [vmem:[%s2876_s26 + $0xe8] sm:$0xff] %v318_v29 }
  0x2e   : > { %321 = vst [vmem:[%s2876_s26 + $0xf0] sm:$0xff] %v320_v30 }
  0x2f   : > { %323 = vst [vmem:[%s2876_s26 + $0xf8] sm:$0xff] %v322_v31 }
  0x30   : > { %325 = vst [vmem:[%s2876_s26 + $0x100] sm:$0xff] %v324_v32 }
  0x31   : > { %327 = vst [vmem:[%s2876_s26 + $0x108] sm:$0xff] %v326_v33 }
  0x32   : > { %329 = vst [vmem:[%s2876_s26 + $0x110] sm:$0xff] %v328_v34 }
  0x33   : > { %331 = vst [vmem:[%s2876_s26 + $0x118] sm:$0xff] %v330_v35 }
  0x34   : > { %333 = vst [vmem:[%s2876_s26 + $0x120] sm:$0xff] %v332_v36 }
  0x35   : > { %335 = vst [vmem:[%s2876_s26 + $0x128] sm:$0xff] %v334_v37 }
  0x36   : > { %337 = vst [vmem:[%s2876_s26 + $0x130] sm:$0xff] %v336_v38 }
  0x37   : > { %339 = vst [vmem:[%s2876_s26 + $0x138] sm:$0xff] %v338_v39 }
  0x38   : > { %341 = vst [vmem:[%s2876_s26 + $0x140] sm:$0xff] %v340_v40 }
  0x39   : > { %343 = vst [vmem:[%s2876_s26 + $0x148] sm:$0xff] %v342_v41 }
  0x3a   : > { %345 = vst [vmem:[%s2876_s26 + $0x150] sm:$0xff] %v344_v42 }
  0x3b   : > { %347 = vst [vmem:[%s2876_s26 + $0x158] sm:$0xff] %v346_v43 }
  0x3c   : > { %349 = vst [vmem:[%s2876_s26 + $0x160] sm:$0xff] %v348_v44 }
  0x3d   : > { %351 = vst [vmem:[%s2876_s26 + $0x168] sm:$0xff] %v350_v45 }
  0x3e   : > { %353 = vst [vmem:[%s2876_s26 + $0x170] sm:$0xff] %v352_v46 }
  0x3f   : > { %355 = vst [vmem:[%s2876_s26 + $0x178] sm:$0xff] %v354_v47 }
  0x40 PF: > { %p2525_p5 = scmp.ge.s32.totalorder %s2812_s14, 1  ;;  %p360_p6 = scmp.lt.s32.totalorder %s2812_s14, 9 }
  0x42   : > { %p361_p7 = pnand %p2525_p5, %p360_p6 }
  0x43   : > { %s367_s29 = sand.u32 (!%p361_p7), 1, %s2804_s12   ;;  %s2814_s7 = smov (!%p361_p7), 120  }
  0x44   : > { %364 = sbr.rel (%p361_p7) target bundleno = 1123 (0x463), region = 66  ;;  %s2815_s8 = smov (!%p361_p7), 112  }
  0x45   : > { %s2697_s30 = smul.u32 (!%p361_p7), 384, %s367_s29  ;;  %s2816_s9 = smov (!%p361_p7), 104  }
  0x46   : > { %s2526_s10 = sshll.u32 (!%p361_p7), %s2519_s15, 4 }
  0x47   : > { %s2977_s4 = scalar_lea.vmem (!%p361_p7), [#allocation2], %s2697_s30  ;;  %p393_p8 = scmp.lt.s32.totalorder (!%p361_p7), %s2526_s10, 127 }
  0x49   : > { %v447_v48 = vld [vmem:[%s3790_s1] sm:$0xff]  ;;  %vm452_vm0 = vcmask 64512   ;;  %v400_v50 = vld [vmem:[%s2977_s4 + $0x8] sm:$0xff]  ;;  %v401_v51 = vld [vmem:[%s2977_s4 + $0x10] sm:$0xff]  ;;  %s3801_s10 = smov (!%p393_p8, %s2526_s10), 127 }
  0x4a   : > { %612 = vmatpush.msra.mxu0 %v447_v48  ;;  %2693 = vmatpush.msra.mxu1 %v447_v48  ;;  %v399_v49 = vld [vmem:[%s2977_s4] sm:$0xff]  ;;  %v402_v52 = vld [vmem:[%s2977_s4 + $0x18] sm:$0xff]  ;;  %v404_v54 = vld [vmem:[%s2977_s4 + $0x28] sm:$0xff]  ;;  %s2692_s11 = sshll.u32 %s3801_s10, 4 }
  0x4b   : > { %2694 = vmatpush.msra.mxu2 %v447_v48  ;;  %2695 = vmatpush.msra.mxu3 %v447_v48  ;;  %v403_v53 = vld [vmem:[%s2977_s4 + $0x20] sm:$0xff]  ;;  %v405_v55 = vld [vmem:[%s2977_s4 + $0x30] sm:$0xff]  ;;  %v406_v56 = vld [vmem:[%s2977_s4 + $0x38] sm:$0xff]  ;;  %s3711_s15 = scalar_lea.vmem %s3792_s3, %s2692_s11 }
  0x4c   : > { %2529 = vmatmul.msk.f32.vlgmr.msra.gmra.mxu0 %vm452_vm0, %v399_v49  ;;  %v407_v57 = vld [vmem:[%s2977_s4 + $0x40] sm:$0xff]  ;;  %v408_v58 = vld [vmem:[%s2977_s4 + $0x48] sm:$0xff]  ;;  %v409_v59 = vld [vmem:[%s2977_s4 + $0x50] sm:$0xff] }
  0x4d   : > { %v410_v60 = vld [vmem:[%s2977_s4 + $0x58] sm:$0xff]  ;;  %v411_v61 = vld [vmem:[%s2977_s4 + $0x60] sm:$0xff]  ;;  %v412_v62 = vld [vmem:[%s2977_s4 + $0x68] sm:$0xff] }
  0x4e   : > { %v413_v63 = vld [vmem:[%s2977_s4 + $0x70] sm:$0xff]  ;;  %v423_v0 = vld [vmem:[%s2977_s4 + $0xc0] sm:$0xff]  ;;  %v414_v1 = vld [vmem:[%s2977_s4 + $0x78] sm:$0xff] }
  0x4f   : > { %2553 = vmatmul.msk.f32.vlgmr.msra.gmra.mxu1 %vm452_vm0, %v423_v0  ;;  %v424_v2 = vld [vmem:[%s2977_s4 + $0xc8] sm:$0xff]  ;;  %v415_v4 = vld [vmem:[%s2977_s4 + $0x80] sm:$0xff]  ;;  %v425_v5 = vld [vmem:[%s2977_s4 + $0xd0] sm:$0xff] }
  0x50   : > { %v416_v7 = vld [vmem:[%s2977_s4 + $0x88] sm:$0xff]  ;;  %v426_v8 = vld [vmem:[%s2977_s4 + $0xd8] sm:$0xff]  ;;  %v417_v10 = vld [vmem:[%s2977_s4 + $0x90] sm:$0xff] }
  0x51   : > { %v427_v11 = vld [vmem:[%s2977_s4 + $0xe0] sm:$0xff]  ;;  %v418_v13 = vld [vmem:[%s2977_s4 + $0x98] sm:$0xff]  ;;  %v428_v14 = vld [vmem:[%s2977_s4 + $0xe8] sm:$0xff] }
  0x52   : > { %v419_v16 = vld [vmem:[%s2977_s4 + $0xa0] sm:$0xff]  ;;  %v429_v17 = vld [vmem:[%s2977_s4 + $0xf0] sm:$0xff]  ;;  %v420_v19 = vld [vmem:[%s2977_s4 + $0xa8] sm:$0xff] }
  0x53   : > { %v430_v20 = vld [vmem:[%s2977_s4 + $0xf8] sm:$0xff]  ;;  %v421_v22 = vld [vmem:[%s2977_s4 + $0xb0] sm:$0xff]  ;;  %v431_v30 = vld [vmem:[%s2977_s4 + $0x100] sm:$0xff] }
  0x54   : > { %2530 = vmatmul.msk.f32.gmra.mxu0 %vm452_vm0, %v400_v50  ;;  %v422_v24 = vld [vmem:[%s2977_s4 + $0xb8] sm:$0xff]  ;;  %2561 = vmatmul.msk.f32.vlgmr.msra.gmra.mxu2 %vm452_vm0, %v431_v30  ;;  %v432_v32 = vld [vmem:[%s2977_s4 + $0x108] sm:$0xff]  ;;  %v433_v34 = vld [vmem:[%s2977_s4 + $0x110] sm:$0xff] }
  0x55   : > { %v434_v37 = vld [vmem:[%s2977_s4 + $0x118] sm:$0xff]  ;;  %v435_v40 = vld [vmem:[%s2977_s4 + $0x120] sm:$0xff]  ;;  %v436_v46 = vld [vmem:[%s2977_s4 + $0x128] sm:$0xff] }
  0x56   : > { %v3087_v41 = vld [vmem:[%s3791_s2] ss:$0 sm:$0xff]  ;;  %v440_v47 = vld [vmem:[%s2977_s4 + $0x148] sm:$0xff] }
  0x57   : > { %2554 = vmatmul.msk.f32.gmra.mxu1 %vm452_vm0, %v424_v2  ;;  %v439_v42 = vld [vmem:[%s2977_s4 + $0x140] sm:$0xff] }
  0x58   : > { %2569 = vmatmul.msk.f32.vlgmr.msra.gmra.mxu3 %vm452_vm0, %v439_v42 }
  0x5c   : > { %2531 = vmatmul.msk.f32.gmra.mxu0 %vm452_vm0, %v401_v51  ;;  %2562 = vmatmul.msk.f32.gmra.mxu2 %vm452_vm0, %v432_v32  ;;  %v441_v51 = vld [vmem:[%s2977_s4 + $0x150] sm:$0xff] }
  0x5f   : > { %2555 = vmatmul.msk.f32.gmra.mxu1 %vm452_vm0, %v425_v5 }
  0x60   : > { %2570 = vmatmul.msk.f32.gmra.mxu3 %vm452_vm0, %v440_v47 }
  0x64   : > { %2532 = vmatmul.msk.f32.gmra.mxu0 %vm452_vm0, %v402_v52  ;;  %2563 = vmatmul.msk.f32.gmra.mxu2 %vm452_vm0, %v433_v34  ;;  %v437_v52 = vld [vmem:[%s2977_s4 + $0x130] sm:$0xff] }
  0x67   : > { %2556 = vmatmul.msk.f32.gmra.mxu1 %vm452_vm0, %v426_v8  ;;  %v445_v8 = vld [vmem:[%s2977_s4 + $0x170] sm:$0xff] }
  0x68   : > { %2571 = vmatmul.msk.f32.gmra.mxu3 %vm452_vm0, %v441_v51 }
  0x6c   : > { %2533 = vmatmul.msk.f32.gmra.mxu0 %vm452_vm0, %v403_v53  ;;  %2564 = vmatmul.msk.f32.gmra.mxu2 %vm452_vm0, %v434_v37 }
  0x6f   : > { %2557 = vmatmul.msk.f32.gmra.mxu1 %vm452_vm0, %v427_v11 }
  0x74   : > { %2534 = vmatmul.msk.f32.gmra.mxu0 %vm452_vm0, %v404_v54  ;;  %2565 = vmatmul.msk.f32.gmra.mxu2 %vm452_vm0, %v435_v40 }
  0x77   : > { %2558 = vmatmul.msk.f32.gmra.mxu1 %vm452_vm0, %v428_v14 }
  0x7c   : > { %2535 = vmatmul.msk.f32.gmra.mxu0 %vm452_vm0, %v405_v55  ;;  %2566 = vmatmul.msk.f32.gmra.mxu2 %vm452_vm0, %v436_v46  ;;  %v442_v55 = vld [vmem:[%s2977_s4 + $0x158] sm:$0xff] }
  0x7d   : > { %2572 = vmatmul.msk.f32.gmra.mxu3 %vm452_vm0, %v442_v55 }
  0x7f   : > { %2559 = vmatmul.msk.f32.gmra.mxu1 %vm452_vm0, %v429_v17  ;;  %v446_v17 = vld [vmem:[%s2977_s4 + $0x178] sm:$0xff] }
  0x84   : > { %2536 = vmatmul.msk.f32.gmra.mxu0 %vm452_vm0, %v406_v56  ;;  %2567 = vmatmul.msk.f32.gmra.mxu2 %vm452_vm0, %v437_v52  ;;  %v438_v56 = vld [vmem:[%s2977_s4 + $0x138] sm:$0xff] }
  0x87   : > { %2560 = vmatmul.msk.f32.gmra.mxu1 %vm452_vm0, %v430_v20 }
  0x8c   : > { %2537 = vmatmul.msk.f32.gmra.mxu0 %vm452_vm0, %v407_v57  ;;  %2568 = vmatmul.msk.f32.gmra.mxu2 %vm452_vm0, %v438_v56 }
  0x94   : > { %2538 = vmatmul.msk.f32.gmra.mxu0 %vm452_vm0, %v408_v58 }
  0x9c   : > { %2539 = vmatmul.msk.f32.gmra.mxu0 %vm452_vm0, %v409_v59 }
  0xa4   : > { %2540 = vmatmul.msk.f32.gmra.mxu0 %vm452_vm0, %v410_v60  ;;  %v443_v60 = vld [vmem:[%s2977_s4 + $0x160] sm:$0xff] }
  0xa5   : > { %2573 = vmatmul.msk.f32.gmra.mxu3 %vm452_vm0, %v443_v60 }
  0xac   : > { %2541 = vmatmul.msk.f32.gmra.mxu0 %vm452_vm0, %v411_v61 }
  0xb4   : > { %2542 = vmatmul.msk.f32.gmra.mxu0 %vm452_vm0, %v412_v62 }
  0xbc   : > { %2543 = vmatmul.msk.f32.gmra.mxu0 %vm452_vm0, %v413_v63 }
  0xc4   : > { %2544 = vmatmul.msk.f32.gmra.mxu0 %vm452_vm0, %v414_v1  ;;  %v444_v1 = vld [vmem:[%s2977_s4 + $0x168] sm:$0xff] }
  0xc5   : > { %2574 = vmatmul.msk.f32.gmra.mxu3 %vm452_vm0, %v444_v1 }
  0xc9   : > { %v3015_v3 = vpop.f32.mrf.mxu0 }
  0xcc   : > { %2545 = vmatmul.msk.f32.gmra.mxu0 %vm452_vm0, %v415_v4  ;;  %v686_v35 = vpop.f32.mrf.mxu1 }
  0xcd   : > { %v687_v2 = vadd.f32 %v3087_v41, %v686_v35  ;;  %2575 = vmatmul.msk.f32.gmra.mxu3 %vm452_vm0, %v445_v8 }
  0xd1   : > { %v3021_v6 = vpop.f32.mrf.mxu0 }
  0xd2   : > { %v618_v40 = vadd.f32 %v3087_v41, %v3021_v6 }
  0xd4   : > { %2546 = vmatmul.msk.f32.gmra.mxu0 %vm452_vm0, %v416_v7  ;;  %v689_v39 = vpop.f32.mrf.mxu1 }
  0xd5   : > { %2576 = vmatmul.msk.f32.gmra.mxu3 %vm452_vm0, %v446_v17 }
  0xd7   : > { %v710_v32 = vpop.f32.mrf.mxu2 }
  0xd8   : > { %v3145_v34 = vadd.f32 %v3087_v41, %v710_v32 }
  0xd9   : > { %v3027_v9 = vpop.f32.mrf.mxu0 }
  0xda   : > { %v621_v60 = vadd.f32 %v3087_v41, %v3027_v9 }
  0xdb   : > { %v734_v47 = vpop.f32.mrf.mxu3 }
  0xdc   : > { %2547 = vmatmul.msk.f32.gmra.mxu0 %vm452_vm0, %v417_v10  ;;  %v692_v45 = vpop.f32.mrf.mxu1  ;;  %v690_v10 = vadd.f32 %v3087_v41, %v689_v39 }
  0xdf   : > { %v713_v35 = vpop.f32.mrf.mxu2 }
  0xe0   : > { %v3150_v37 = vadd.f32 %v3087_v41, %v713_v35 }
  0xe1   : > { %v3033_v12 = vpop.f32.mrf.mxu0 }
  0xe2   : > { %v624_v6 = vadd.f32 %v3087_v41, %v3033_v12 }
  0xe4   : > { %2548 = vmatmul.msk.f32.gmra.mxu0 %vm452_vm0, %v418_v13  ;;  %v695_v50 = vpop.f32.mrf.mxu1 }
  0xe5   : > { %v696_v11 = vadd.f32 %v3087_v41, %v695_v50  ;;  %v737_v50 = vpop.f32.mrf.mxu3 }
  0xe9   : > { %v3039_v15 = vpop.f32.mrf.mxu0 }
  0xea   : > { %v627_v12 = vadd.f32 %v3087_v41, %v3039_v15 }
  0xec   : > { %2549 = vmatmul.msk.f32.gmra.mxu0 %vm452_vm0, %v419_v16  ;;  %v698_v57 = vpop.f32.mrf.mxu1 }
  0xed   : > { %v699_v20 = vadd.f32 %v3087_v41, %v698_v57 }
  0xf1   : > { %v3045_v18 = vpop.f32.mrf.mxu0 }
  0xf4   : > { %2550 = vmatmul.msk.f32.gmra.mxu0 %vm452_vm0, %v420_v19  ;;  %v701_v0 = vpop.f32.mrf.mxu1  ;;  %v693_v19 = vadd.f32 %v3087_v41, %v692_v45  ;;  %v615_v45 = vadd.f32 %v3087_v41, %v3015_v3 }
  0xf9   : > { %v3051_v21 = vpop.f32.mrf.mxu0 }
  0xfc   : > { %2551 = vmatmul.msk.f32.gmra.mxu0 %vm452_vm0, %v421_v22  ;;  %v704_v7 = vpop.f32.mrf.mxu1 }
  0xfd   : > { %v705_v30 = vadd.f32 %v3087_v41, %v704_v7 }
 0x101   : > { %v3055_v23 = vpop.f32.mrf.mxu0 }
 0x102   : > { %v636_v15 = vadd.f32 %v3087_v41, %v3055_v23 }
 0x104   : > { %2552 = vmatmul.msk.f32.gmra.mxu0 %vm452_vm0, %v422_v24  ;;  %v707_v16 = vpop.f32.mrf.mxu1  ;;  %v702_v24 = vadd.f32 %v3087_v41, %v701_v0 }
 0x105   : > { %v708_v22 = vadd.f32 %v3087_v41, %v707_v16 }
 0x109   : > { %v3059_v25 = vpop.f32.mrf.mxu0 }
 0x111   : > { %v3061_v26 = vpop.f32.mrf.mxu0 }
 0x119   : > { %v3063_v27 = vpop.f32.mrf.mxu0 }
 0x11a   : > { %v645_v7 = vadd.f32 %v3087_v41, %v3063_v27 }
 0x121   : > { %v3065_v28 = vpop.f32.mrf.mxu0 }
 0x129   : > { %v3067_v29 = vpop.f32.mrf.mxu0 }
 0x131   : > { %v3071_v31 = vpop.f32.mrf.mxu0 }
 0x132   : > { %v654_v16 = vadd.f32 %v3087_v41, %v3071_v31 }
 0x139   : > { %v3075_v33 = vpop.f32.mrf.mxu0 }
 0x141   : > { %v3079_v36 = vpop.f32.mrf.mxu0 }
 0x149   : > { %v662_v38 = vpop.f32.mrf.mxu0 }
 0x14a   : > { %v663_v49 = vadd.f32 %v3087_v41, %v662_v38  ;;  %v716_v38 = vpop.f32.mrf.mxu2 }
 0x151   : > { %v665_v43 = vpop.f32.mrf.mxu0 }
 0x152   : > { %v666_v44 = vadd.f32 %v3087_v41, %v665_v43  ;;  %v719_v42 = vpop.f32.mrf.mxu2 }
 0x153   : > { %v3164_v46 = vadd.f32 %v3087_v41, %v719_v42 }
 0x154   : > { %787 = vrot.lane.b32.xlu0 %v666_v44, %s2814_s7 }
 0x159   : > { %v668_v48 = vpop.f32.mrf.mxu0 }
 0x15a   : > { %v669_v62 = vadd.f32 %v3087_v41, %v668_v48  ;;  %v722_v48 = vpop.f32.mrf.mxu2 }
 0x15b   : > { %v3175_v3 = vadd.f32 %v3087_v41, %v722_v48 }
 0x15c   : > { %759 = vrot.lane.b32.xlu0 %v663_v49, %s2814_s7  ;;  %v3171_v49 = vadd.f32 %v3087_v41, %v716_v38 }
 0x161   : > { %v671_v53 = vpop.f32.mrf.mxu0 }
 0x162   : > { %v672_v54 = vadd.f32 %v3087_v41, %v671_v53  ;;  %v725_v51 = vpop.f32.mrf.mxu2 }
 0x164   : > { %843 = vrot.lane.b32.xlu2 %v672_v54, %s2814_s7  ;;  %v740_v54 = vpop.f32.mrf.mxu3 }
 0x165   : > { %v3187_v56 = vadd.f32 %v3087_v41, %v740_v54 }
 0x169   : > { %v674_v58 = vpop.f32.mrf.mxu0 }
 0x16a   : > { %v675_v59 = vadd.f32 %v3087_v41, %v674_v58  ;;  %v728_v55 = vpop.f32.mrf.mxu2 }
 0x16c   : > { %871 = vrot.lane.b32.xlu1 %v675_v59, %s2814_s7 }
 0x171   : > { %v677_v61 = vpop.f32.mrf.mxu0 }
 0x172   : > { %v678_v63 = vadd.f32 %v3087_v41, %v677_v61  ;;  %v3201_v61 = vadd.f32 %v3087_v41, %v728_v55 }
 0x174   : > { %815 = vrot.lane.b32.xlu1 %v669_v62, %s2814_s7  ;;  %899 = vrot.lane.b32.xlu0 %v678_v63, %s2814_s7  ;;  %v743_v62 = vpop.f32.mrf.mxu3  ;;  %v731_v63 = vpop.f32.mrf.mxu2 }
 0x175   : > { %v3206_v9 = vadd.f32 %v3087_v41, %v731_v63 }
 0x179   : > { %v680_v4 = vpop.f32.mrf.mxu0 }
 0x17a   : > { %v681_v5 = vadd.f32 %v3087_v41, %v680_v4  ;;  %v633_v4 = vadd.f32 %v3087_v41, %v3051_v21 }
 0x17c   : > { %927 = vrot.lane.b32.xlu1 %v681_v5, %s2814_s7  ;;  %983 = vrot.lane.b32.xlu0 %v687_v2, %s2814_s7  ;;  %v630_v2 = vadd.f32 %v3087_v41, %v3045_v18  ;;  %v3215_v5 = vadd.f32 %v3087_v41, %v734_v47  ;;  %v3226_v18 = vadd.f32 %v3087_v41, %v725_v51  ;;  %v746_v21 = vpop.f32.mrf.mxu3 }
 0x17d   : > { %v3231_v8 = vadd.f32 %v3087_v41, %v746_v21 }
 0x181   : > { %v683_v13 = vpop.f32.mrf.mxu0 }
 0x182   : > { %v684_v14 = vadd.f32 %v3087_v41, %v683_v13  ;;  %v642_v13 = vadd.f32 %v3087_v41, %v3061_v26  ;;  %v3253_v26 = vadd.f32 %v3087_v41, %v737_v50 }
 0x184   : > { %1011 = vrot.lane.b32.xlu1 %v690_v10, %s2814_s7  ;;  %955 = vrot.lane.b32.xlu2 %v684_v14, %s2814_s7  ;;  %v749_v17 = vpop.f32.mrf.mxu3 }
 0x185   : > { %1067 = vrot.lane.b32.xlu0 %v696_v11, %s2814_s7  ;;  %v639_v11 = vadd.f32 %v3087_v41, %v3059_v25  ;;  %v3250_v25 = vadd.f32 %v3087_v41, %v743_v62 }
 0x18c   : > { %1095 = vrot.lane.b32.xlu1 %v699_v20, %s2814_s7  ;;  %1039 = vrot.lane.b32.xlu2 %v693_v19, %s2814_s7  ;;  %v3256_v19 = vadd.f32 %v3087_v41, %v749_v17 }
 0x18d   : > { %1179 = vrot.lane.b32.xlu0 %v708_v22, %s2814_s7  ;;  %v648_v22 = vadd.f32 %v3087_v41, %v3065_v28  ;;  %v657_v28 = vadd.f32 %v3087_v41, %v3075_v33 }
 0x194   : > { %1123 = vrot.lane.b32.xlu2 %v702_v24, %s2814_s7  ;;  %1787 = vrot.lane.b32.xlu1 %v3206_v9, %s2815_s8  ;;  %v651_v24 = vadd.f32 %v3087_v41, %v3067_v29  ;;  %v660_v29 = vadd.f32 %v3087_v41, %v3079_v36 }
 0x195   : > { %1619 = vrot.lane.b32.xlu0 %v3150_v37, %s2815_s8 }
 0x19c   : > { %1151 = vrot.lane.b32.xlu2 %v705_v30, %s2814_s7  ;;  %1731 = vrot.lane.b32.xlu1 %v3226_v18, %s2815_s8  ;;  %v3272_v30 = vpop.f32.mrf.mxu3 }
 0x19d   : > { %1675 = vrot.lane.b32.xlu0 %v3164_v46, %s2815_s8 }
 0x1a4   : > { %1591 = vrot.lane.b32.xlu2 %v3145_v34, %s2815_s8  ;;  %1843 = vrot.lane.b32.xlu1 %v3253_v26, %s2815_s8  ;;  %v755_v32 = vpop.f32.mrf.mxu3 }
 0x1a5   : > { %1647 = vrot.lane.b32.xlu0 %v3171_v49, %s2815_s8  ;;  %v3281_v35 = vadd.f32 %v3087_v41, %v755_v32 }
 0x1ac   : > { %1703 = vrot.lane.b32.xlu2 %v3175_v3, %s2815_s8 }
 0x1ad   : > { %1759 = vrot.lane.b32.xlu0 %v3201_v61, %s2815_s8 }
 0x1b4   : > { %1871 = vrot.lane.b32.xlu2 %v3187_v56, %s2815_s8 }
 0x1b5   : > { %1815 = vrot.lane.b32.xlu0 %v3215_v5, %s2815_s8 }
 0x1bc   : > { %1927 = vrot.lane.b32.xlu2 %v3231_v8, %s2815_s8 }
 0x1bd   : > { %1955 = vrot.lane.b32.xlu0 %v3256_v19, %s2815_s8 }
 0x1be   : > { %v844_v44 = vpop.permute.xlu2 %843 }
 0x1c4   : > { %1899 = vrot.lane.b32.xlu2 %v3250_v25, %s2815_s8 }
 0x1c5   : > { %2011 = vrot.lane.b32.xlu0 %v3281_v35, %s2815_s8 }
 0x1c6   : > { %v788_v39 = vpop.permute.xlu0 %787 }
 0x1c7   : > { %2579 = vmatpush.xpose.msk.msrb.mxu2 %vm452_vm0, %v788_v39 }
 0x1ca   : > { %2580 = vmatmul.msk.f32.vlgmr.msrb.gmra.mxu2 %vm452_vm0, %v618_v40 }
 0x1ce   : > { %v760_v43 = vpop.permute.xlu0 %759 }
 0x1cf   : > { %2577 = vmatpush.xpose.msk.msrb.mxu1 %vm452_vm0, %v760_v43 }
 0x1d2   : > { %2578 = vmatmul.msk.f32.vlgmr.msrb.gmra.mxu1 %vm452_vm0, %v615_v45 }
 0x1d3   : > { %2583 = vmatpush.xpose.msk.msra.mxu1 %vm452_vm0, %v844_v44 }
 0x1da   : > { %2584 = vmatmul.msk.f32.vlgmr.msra.gmra.mxu1 %vm452_vm0, %v624_v6 }
 0x1de   : > { %v872_v52 = vpop.permute.xlu1 %871  ;;  %v956_v53 = vpop.permute.xlu2 %955 }
 0x1df   : > { %2585 = vmatpush.xpose.msk.msra.mxu2 %vm452_vm0, %v872_v52 }
 0x1e2   : > { %2586 = vmatmul.msk.f32.vlgmr.msra.gmra.mxu2 %vm452_vm0, %v627_v12 }
 0x1e3   : > { %2591 = vmatpush.xpose.msk.msrb.mxu2 %vm452_vm0, %v956_v53 }
 0x1e6   : > { %v816_v57 = vpop.permute.xlu1 %815  ;;  %v1040_v58 = vpop.permute.xlu2 %1039 }
 0x1e7   : > { %2581 = vmatpush.xpose.msk.msrb.mxu3 %vm452_vm0, %v816_v57  ;;  %v900_v59 = vpop.permute.xlu0 %899  ;;  %2597 = vmatpush.xpose.msk.msra.mxu2 %vm452_vm0, %v1040_v58 }
 0x1ea   : > { %2582 = vmatmul.msk.f32.vlgmr.msrb.gmra.mxu3 %vm452_vm0, %v621_v60  ;;  %2592 = vmatmul.msk.f32.vlgmr.msrb.gmra.mxu2 %vm452_vm0, %v636_v15 }
 0x1eb   : > { %2587 = vmatpush.xpose.msk.msra.mxu3 %vm452_vm0, %v900_v59 }
 0x1ee   : > { %v928_v23 = vpop.permute.xlu1 %927  ;;  %v1124_v0 = vpop.permute.xlu2 %1123 }
 0x1ef   : > { %2589 = vmatpush.xpose.msk.msrb.mxu1 %vm452_vm0, %v928_v23  ;;  %v984_v1 = vpop.permute.xlu0 %983  ;;  %2603 = vmatpush.xpose.msk.msrb.mxu2 %vm452_vm0, %v1124_v0 }
 0x1f0   : > { %2593 = vmatpush.xpose.msk.msrb.mxu3 %vm452_vm0, %v984_v1 }
 0x1f2   : > { %2588 = vmatmul.msk.f32.vlgmr.msra.gmra.mxu3 %vm452_vm0, %v630_v2  ;;  %2590 = vmatmul.msk.f32.vlgmr.msrb.gmra.mxu1 %vm452_vm0, %v633_v4 }
 0x1f3   : > { %2598 = vmatmul.msk.f32.vlgmr.msra.gmra.mxu2 %vm452_vm0, %v645_v7 }
 0x1f6   : > { %v1012_v10 = vpop.permute.xlu1 %1011  ;;  %v1152_v14 = vpop.permute.xlu2 %1151 }
 0x1f7   : > { %2595 = vmatpush.xpose.msk.msra.mxu1 %vm452_vm0, %v1012_v10  ;;  %v1068_v27 = vpop.permute.xlu0 %1067 }
 0x1f8   : > { %2599 = vmatpush.xpose.msk.msra.mxu3 %vm452_vm0, %v1068_v27 }
 0x1fa   : > { %2594 = vmatmul.msk.f32.vlgmr.msrb.gmra.mxu3 %vm452_vm0, %v639_v11  ;;  %2596 = vmatmul.msk.f32.vlgmr.msra.gmra.mxu1 %vm452_vm0, %v642_v13 }
 0x1fb   : > { %2604 = vmatmul.msk.f32.vlgmr.msrb.gmra.mxu2 %vm452_vm0, %v654_v16 }
 0x1fc   : > { %2605 = vmatpush.xpose.msk.msrb.mxu3 %vm452_vm0, %v1152_v14 }
 0x1fe   : > { %v1096_v20 = vpop.permute.xlu1 %1095  ;;  %v1592_v38 = vpop.permute.xlu2 %1591 }
 0x1ff   : > { %2601 = vmatpush.xpose.msk.msrb.mxu1 %vm452_vm0, %v1096_v20  ;;  %v1180_v31 = vpop.permute.xlu0 %1179  ;;  %2609 = vmatpush.xpose.msk.msra.mxu2 %vm452_vm0, %v1592_v38 }
 0x202   : > { %2600 = vmatmul.msk.f32.vlgmr.msra.gmra.mxu3 %vm452_vm0, %v648_v22  ;;  %2602 = vmatmul.msk.f32.vlgmr.msrb.gmra.mxu1 %vm452_vm0, %v651_v24 }
 0x203   : > { %2607 = vmatpush.xpose.msk.msra.mxu1 %vm452_vm0, %v1180_v31  ;;  %v3365_v31 = vadd.f32 %v3087_v41, %v3272_v30 }
 0x206   : > { %v1704_v44 = vpop.permute.xlu2 %1703  ;;  %v3302_v6 = vpop.permute.xlu1 %1787 }
 0x207   : > { %v1620_v39 = vpop.permute.xlu0 %1619 }
 0x208   : > { %2611 = vmatpush.xpose.msk.msra.mxu3 %vm452_vm0, %v1620_v39 }
 0x20a   : > { %2606 = vmatmul.msk.f32.vlgmr.msrb.gmra.mxu3 %vm452_vm0, %v657_v28  ;;  %2608 = vmatmul.msk.f32.vlgmr.msra.gmra.mxu1 %vm452_vm0, %v660_v29 }
 0x20c   : > { %2617 = vmatpush.xpose.msk.msrb.mxu3 %vm452_vm0, %v1704_v44 }
 0x20e   : > { %v1732_v52 = vpop.permute.xlu1 %1731  ;;  %v3359_v17 = vpop.permute.xlu2 %1871 }
 0x20f   : > { %v1676_v43 = vpop.permute.xlu0 %1675 }
 0x210   : > { %2615 = vmatpush.xpose.msk.msrb.mxu2 %vm452_vm0, %v1676_v43 }
 0x216   : > { %v3369_v22 = vpop.permute.xlu2 %1927 }
 0x217   : > { %v1648_v48 = vpop.permute.xlu0 %1647 }
 0x218   : > { %2613 = vmatpush.xpose.msk.msrb.mxu1 %vm452_vm0, %v1648_v48 }
 0x21c   : > { %2619 = vmatpush.xpose.msk.msra.mxu1 %vm452_vm0, %v1732_v52 }
 0x21e   : > { %v3375_v29 = vpop.permute.xlu2 %1899 }
 0x21f   : > { %v3361_v20 = vpop.permute.xlu0 %1759 }
 0x227   : > { %v3371_v24 = vpop.permute.xlu0 %1815 }
 0x22f   : > { %v3373_v28 = vpop.permute.xlu0 %1955 }
 0x237   : > { %v3379_v38 = vpop.permute.xlu0 %2011 }
 0x24d   : > { %v3287_v33 = vpop.f32.mrf.mxu2 }
 0x24e   : > { %v1209_v36 = vsel %vm452_vm0, %v3287_v33, -inf }
 0x24f   : > { %1210 = vmax.xlane.f32.xlu2 %v1209_v36  ;;  %v3291_v40 = vpop.f32.mrf.mxu1 }
 0x250   : > { %v1206_v42 = vsel %vm452_vm0, %v3291_v40, -inf }
 0x251   : > { %1207 = vmax.xlane.f32.xlu1 %v1206_v42 }
 0x257   : > { %v3297_v45 = vpop.f32.mrf.mxu1 }
 0x258   : > { %v1215_v47 = vsel %vm452_vm0, %v3297_v45, -inf }
 0x259   : > { %1216 = vmax.xlane.f32.xlu0 %v1215_v47 }
 0x265   : > { %v3304_v50 = vpop.f32.mrf.mxu2 }
 0x266   : > { %v1218_v51 = vsel %vm452_vm0, %v3304_v50, -inf }
 0x267   : > { %1219 = vmax.xlane.f32.xlu2 %v1218_v51 }
 0x26d   : > { %v3309_v53 = vpop.f32.mrf.mxu3  ;;  %v3311_v12 = vpop.f32.mrf.mxu2 }
 0x26e   : > { %v1212_v54 = vsel %vm452_vm0, %v3309_v53, -inf  ;;  %v1227_v55 = vsel %vm452_vm0, %v3311_v12, -inf }
 0x26f   : > { %1213 = vmax.xlane.f32.xlu1 %v1212_v54  ;;  %1228 = vmax.xlane.f32.xlu0 %v1227_v55  ;;  %v3317_v57 = vpop.f32.mrf.mxu1 }
 0x270   : > { %v1224_v58 = vsel %vm452_vm0, %v3317_v57, -inf }
 0x271   : > { %1225 = vmax.xlane.f32.xlu2 %v1224_v58 }
 0x275   : > { %v3321_v59 = vpop.f32.mrf.mxu3 }
 0x276   : > { %v3323_v60 = vpop.f32.mrf.mxu2  ;;  %v1221_v15 = vsel %vm452_vm0, %v3321_v59, -inf }
 0x277   : > { %1222 = vmax.xlane.f32.xlu1 %v1221_v15  ;;  %v1236_v62 = vsel %vm452_vm0, %v3323_v60, -inf  ;;  %v3329_v63 = vpop.f32.mrf.mxu1 }
 0x278   : > { %1237 = vmax.xlane.f32.xlu0 %v1236_v62  ;;  %v1233_v23 = vsel %vm452_vm0, %v3329_v63, -inf }
 0x279   : > { %1234 = vmax.xlane.f32.xlu2 %v1233_v23 }
 0x27d   : > { %v3333_v0 = vpop.f32.mrf.mxu3 }
 0x27e   : > { %v1230_v1 = vsel %vm452_vm0, %v3333_v0, -inf  ;;  %v3353_v14 = vpop.f32.mrf.mxu2 }
 0x27f   : > { %1231 = vmax.xlane.f32.xlu1 %v1230_v1  ;;  %v3337_v2 = vpop.f32.mrf.mxu1  ;;  %v1245_v16 = vsel %vm452_vm0, %v3353_v14, -inf }
 0x280   : > { %v1242_v4 = vsel %vm452_vm0, %v3337_v2, -inf }
 0x281   : > { %1243 = vmax.xlane.f32.xlu2 %v1242_v4 }
 0x285   : > { %v3341_v7 = vpop.f32.mrf.mxu3 }
 0x286   : > { %v1239_v21 = vsel %vm452_vm0, %v3341_v7, -inf }
 0x287   : > { %1240 = vmax.xlane.f32.xlu1 %v1239_v21  ;;  %v3345_v10 = vpop.f32.mrf.mxu1 }
 0x288   : > { %v1251_v27 = vsel %vm452_vm0, %v3345_v10, -inf }
 0x289   : > { %1252 = vmax.xlane.f32.xlu2 %v1251_v27 }
 0x28d   : > { %v3349_v11 = vpop.f32.mrf.mxu3 }
 0x28e   : > { %v1248_v13 = vsel %vm452_vm0, %v3349_v11, -inf }
 0x28f   : > { %1249 = vmax.xlane.f32.xlu0 %v1248_v13 }
 0x297   : > { %1246 = vmax.xlane.f32.xlu0 %v1245_v16 }
 0x2a1   : > { %2054 = vrot.lane.b32.xlu2 %v3145_v34, %s2816_s9  ;;  %v3377_v34 = vpop.permute.xlu1 %1843 }
 0x2ab   : > { %1983 = vrot.lane.b32.xlu0 %v3365_v31, %s2815_s8 }
 0x2c2   : > { %v1211_v32 = vpop.xlane.xlu2 %1210 }
 0x2c3   : > { %v1255_v39 = vsub.f32 %v3287_v33, %v1211_v32 }
 0x2c4   : > { %v1208_v41 = vpop.xlane.xlu1 %1207 }
 0x2c5   : > { %v1272_v30 = vmul.f32 1.442695, %v1255_v39  ;;  %v1254_v36 = vsub.f32 %v3291_v40, %v1208_v41 }
 0x2c7   : > { %2726 = vpow2.f32 %v1272_v30  ;;  %v1270_v42 = vmul.f32 1.442695, %v1254_v36 }
 0x2c9   : > { %2728 = vpow2.f32 %v1270_v42 }
 0x2cc   : > { %v1217_v43 = vpop.xlane.xlu0 %1216 }
 0x2cd   : > { %v3383_v44 = vpop.eup %2726  ;;  %v1257_v47 = vsub.f32 %v3297_v45, %v1217_v43 }
 0x2ce   : > { %v1305_v48 = vsel %vm452_vm0, %v3383_v44, 0.0 }
 0x2cf   : > { %v3388_v51 = vpop.eup %2728  ;;  %v1276_v52 = vmul.f32 1.442695, %v1257_v47  ;;  %1306 = vadd.xlane.f32.xlu2 %v1305_v48 }
 0x2d0   : > { %v1302_v33 = vsel %vm452_vm0, %v3388_v51, 0.0 }
 0x2d1   : > { %2730 = vpow2.f32 %v1276_v52  ;;  %1303 = vadd.xlane.f32.xlu1 %v1302_v33 }
 0x2d7   : > { %v3392_v40 = vpop.eup %2730 }
 0x2d8   : > { %v1311_v54 = vsel %vm452_vm0, %v3392_v40, 0.0 }
 0x2d9   : > { %1312 = vadd.xlane.f32.xlu0 %v1311_v54 }
 0x2da   : > { %v1220_v55 = vpop.xlane.xlu2 %1219 }
 0x2db   : > { %v1258_v45 = vsub.f32 %v3304_v50, %v1220_v55 }
 0x2dd   : > { %v1278_v58 = vmul.f32 1.442695, %v1258_v45 }
 0x2df   : > { %2732 = vpow2.f32 %v1278_v58 }
 0x2e2   : > { %v1214_v15 = vpop.xlane.xlu1 %1213  ;;  %v1229_v33 = vpop.xlane.xlu0 %1228 }
 0x2e3   : > { %v1256_v62 = vsub.f32 %v3309_v53, %v1214_v15 }
 0x2e4   : > { %v1226_v23 = vpop.xlane.xlu2 %1225 }
 0x2e5   : > { %v3398_v1 = vpop.eup %2732  ;;  %v1274_v4 = vmul.f32 1.442695, %v1256_v62  ;;  %v1260_v21 = vsub.f32 %v3317_v57, %v1226_v23 }
 0x2e6   : > { %v1314_v27 = vsel %vm452_vm0, %v3398_v1, 0.0 }
 0x2e7   : > { %2734 = vpow2.f32 %v1274_v4  ;;  %v1282_v13 = vmul.f32 1.442695, %v1260_v21  ;;  %1315 = vadd.xlane.f32.xlu1 %v1314_v27 }
 0x2e9   : > { %2736 = vpow2.f32 %v1282_v13 }
 0x2ea   : > { %v1223_v16 = vpop.xlane.xlu1 %1222 }
 0x2eb   : > { %v1259_v50 = vsub.f32 %v3321_v59, %v1223_v16  ;;  %v1238_v13 = vpop.xlane.xlu0 %1237 }
 0x2ec   : > { %v1235_v32 = vpop.xlane.xlu2 %1234 }
 0x2ed   : > { %v3404_v39 = vpop.eup %2734  ;;  %v1280_v53 = vmul.f32 1.442695, %v1259_v50  ;;  %v1263_v47 = vsub.f32 %v3329_v63, %v1235_v32  ;;  %v1261_v63 = vsub.f32 %v3311_v12, %v1229_v33 }
 0x2ee   : > { %v1308_v41 = vsel %vm452_vm0, %v3404_v39, 0.0 }
 0x2ef   : > { %v3408_v30 = vpop.eup %2736  ;;  %2738 = vpow2.f32 %v1280_v53  ;;  %1309 = vadd.xlane.f32.xlu2 %v1308_v41  ;;  %v1288_v45 = vmul.f32 1.442695, %v1263_v47  ;;  %v1284_v16 = vmul.f32 1.442695, %v1261_v63 }
 0x2f0   : > { %v1320_v57 = vsel %vm452_vm0, %v3408_v30, 0.0 }
 0x2f1   : > { %1321 = vadd.xlane.f32.xlu0 %v1320_v57 }
 0x2f2   : > { %v1232_v36 = vpop.xlane.xlu1 %1231 }
 0x2f3   : > { %v1262_v42 = vsub.f32 %v3333_v0, %v1232_v36 }
 0x2f4   : > { %v1244_v43 = vpop.xlane.xlu2 %1243 }
 0x2f5   : > { %v3413_v59 = vpop.eup %2738  ;;  %v1286_v48 = vmul.f32 1.442695, %v1262_v42  ;;  %v1266_v52 = vsub.f32 %v3337_v2, %v1244_v43 }
 0x2f6   : > { %v1317_v54 = vsel %vm452_vm0, %v3413_v59, 0.0 }
 0x2f7   : > { %2740 = vpow2.f32 %v1286_v48  ;;  %v1294_v55 = vmul.f32 1.442695, %v1266_v52  ;;  %1318 = vadd.xlane.f32.xlu1 %v1317_v54 }
 0x2f9   : > { %2742 = vpow2.f32 %v1294_v55 }
 0x2fa   : > { %v1241_v58 = vpop.xlane.xlu1 %1240  ;;  %2744 = vpow2.f32 %v1288_v45 }
 0x2fb   : > { %v1265_v0 = vsub.f32 %v3341_v7, %v1241_v58 }
 0x2fc   : > { %v1253_v15 = vpop.xlane.xlu2 %1252 }
 0x2fd   : > { %v3420_v62 = vpop.eup %2740  ;;  %v1292_v23 = vmul.f32 1.442695, %v1265_v0  ;;  %v1269_v2 = vsub.f32 %v3345_v10, %v1253_v15  ;;  %v1264_v10 = vsub.f32 %v3323_v60, %v1238_v13 }
 0x2fe   : > { %v1326_v4 = vsel %vm452_vm0, %v3420_v62, 0.0 }
 0x2ff   : > { %v3426_v21 = vpop.eup %2742  ;;  %2746 = vpow2.f32 %v1292_v23  ;;  %v1300_v27 = vmul.f32 1.442695, %v1269_v2  ;;  %1327 = vadd.xlane.f32.xlu1 %v1326_v4  ;;  %v1290_v42 = vmul.f32 1.442695, %v1264_v10 }
 0x300   : > { %v1338_v7 = vsel %vm452_vm0, %v3426_v21, 0.0  ;;  %v3430_v12 = vpop.eup %2744 }
 0x301   : > { %2748 = vpow2.f32 %v1300_v27  ;;  %1339 = vadd.xlane.f32.xlu2 %v1338_v7  ;;  %v1329_v53 = vsel %vm452_vm0, %v3430_v12, 0.0 }
 0x302   : > { %2750 = vpow2.f32 %v1284_v16  ;;  %v1250_v57 = vpop.xlane.xlu0 %1249 }
 0x303   : > { %2752 = vpow2.f32 %v1290_v42  ;;  %v1268_v60 = vsub.f32 %v3349_v11, %v1250_v57 }
 0x305   : > { %v3432_v50 = vpop.eup %2746  ;;  %v1298_v48 = vmul.f32 1.442695, %v1268_v60 }
 0x306   : > { %v1335_v32 = vsel %vm452_vm0, %v3432_v50, 0.0 }
 0x307   : > { %v3439_v41 = vpop.eup %2748  ;;  %1336 = vadd.xlane.f32.xlu0 %v1335_v32  ;;  %1330 = vadd.xlane.f32.xlu1 %v1329_v53  ;;  %2754 = vpow2.f32 %v1298_v48 }
 0x308   : > { %v1347_v36 = vsel %vm452_vm0, %v3439_v41, 0.0  ;;  %v3443_v43 = vpop.eup %2750 }
 0x309   : > { %1348 = vadd.xlane.f32.xlu2 %v1347_v36  ;;  %v1323_v47 = vsel %vm452_vm0, %v3443_v43, 0.0  ;;  %v3448_v33 = vpop.eup %2752 }
 0x30a   : > { %v1247_v52 = vpop.xlane.xlu0 %1246  ;;  %v1332_v55 = vsel %vm452_vm0, %v3448_v33, 0.0 }
 0x30b   : > { %v1267_v54 = vsub.f32 %v3353_v14, %v1247_v52 }
 0x30d   : > { %v1296_v45 = vmul.f32 1.442695, %v1267_v54  ;;  %v3453_v58 = vpop.eup %2754 }
 0x30e   : > { %v1344_v11 = vsel %vm452_vm0, %v3453_v58, 0.0 }
 0x30f   : > { %1324 = vadd.xlane.f32.xlu1 %v1323_v47  ;;  %2756 = vpow2.f32 %v1296_v45 }
 0x315   : > { %v3461_v0 = vpop.eup %2756 }
 0x316   : > { %v1341_v14 = vsel %vm452_vm0, %v3461_v0, 0.0 }
 0x317   : > { %1333 = vadd.xlane.f32.xlu1 %v1332_v55 }
 0x31b   : > { %2078 = vrot.lane.b32.xlu0 %v3150_v37, %s2816_s9  ;;  %v3477_v37 = vpop.permute.xlu2 %2054 }
 0x31f   : > { %1345 = vadd.xlane.f32.xlu1 %v1344_v11 }
 0x321   : > { %2126 = vrot.lane.b32.xlu2 %v3164_v46, %s2816_s9 }
 0x323   : > { %2198 = vrot.lane.b32.xlu0 %v3201_v61, %s2816_s9 }
 0x327   : > { %1342 = vadd.xlane.f32.xlu1 %v1341_v14 }
 0x329   : > { %2174 = vrot.lane.b32.xlu2 %v3226_v18, %s2816_s9 }
 0x32b   : > { %2246 = vrot.lane.b32.xlu0 %v3215_v5, %s2816_s9 }
 0x331   : > { %2150 = vrot.lane.b32.xlu2 %v3175_v3, %s2816_s9  ;;  %v3485_v3 = vpop.permute.xlu0 %1983 }
 0x333   : > { %2318 = vrot.lane.b32.xlu0 %v3250_v25, %s2816_s9 }
 0x339   : > { %2222 = vrot.lane.b32.xlu2 %v3206_v9, %s2816_s9 }
 0x33b   : > { %2390 = vrot.lane.b32.xlu0 %v3365_v31, %s2816_s9 }
 0x340   : > { %2102 = vrot.lane.b32.xlu1 %v3171_v49, %s2816_s9 }
 0x341   : > { %2294 = vrot.lane.b32.xlu2 %v3187_v56, %s2816_s9 }
 0x342   : > { %v1307_v46 = vpop.xlane.xlu2 %1306 }
 0x343   : > { %2758 = vrcp.f32 %v1307_v46  ;;  %v1376_v15 = vand.u32 2147483648, %v1307_v46  ;;  %v1374_v63 = vand.u32 2147483647, %v1307_v46  ;;  %vm1370_vm2 = vweird.f32 %v1307_v46 }
 0x344   : > { %v1304_v61 = vpop.xlane.xlu1 %1303 }
 0x345   : > { %2760 = vrcp.f32 %v1304_v61  ;;  %v1361_v2 = vand.u32 2147483648, %v1304_v61  ;;  %vm1375_vm5 = vcmp.eq.f32.partialorder %v1374_v63, 8.507059e+37  ;;  %vm1355_vm6 = vweird.f32 %v1304_v61 }
 0x347   : > { %v1362_v32 = vor.u32 1.1754944e-38, %v1361_v2 }
 0x348   : > { %2270 = vrot.lane.b32.xlu1 %v3253_v26, %s2816_s9  ;;  %v1359_v26 = vand.u32 2147483647, %v1304_v61 }
 0x349   : > { %v2759_v9 = vpop.eup %2758  ;;  %2366 = vrot.lane.b32.xlu2 %v3256_v19, %s2816_s9  ;;  %v1377_v19 = vor.u32 1.1754944e-38, %v1376_v15 }
 0x34a   : > { %v1366_v5 = vmul.f32 %v2759_v9, %v1307_v46  ;;  %vm1371_vm1 = vweird.f32 %v2759_v9  ;;  %vm1360_vm8 = vcmp.eq.f32.partialorder %v1359_v26, 8.507059e+37 }
 0x34b   : > { %v2761_v18 = vpop.eup %2760  ;;  %vm1372_vm4 = vmor %vm1370_vm2, %vm1371_vm1 }
 0x34c   : > { %v1367_v25 = vsub.f32 1.0, %v1366_v5  ;;  %v1351_v49 = vmul.f32 %v2761_v18, %v1304_v61  ;;  %v1313_v31 = vpop.xlane.xlu0 %1312  ;;  %vm1356_vm3 = vweird.f32 %v2761_v18 }
 0x34d   : > { %2762 = vrcp.f32 %v1313_v31  ;;  %vm1357_vm7 = vmor %vm1355_vm6, %vm1356_vm3  ;;  %v1406_v47 = vand.u32 2147483648, %v1313_v31  ;;  %v1404_v52 = vand.u32 2147483647, %v1313_v31  ;;  %vm1400_vm10 = vweird.f32 %v1313_v31 }
 0x34e   : > { %v1368_v56 = vmul.f32 %v2759_v9, %v1367_v25  ;;  %v1352_v23 = vsub.f32 1.0, %v1351_v49 }
 0x34f   : > { %v1407_v54 = vor.u32 1.1754944e-38, %v1406_v47  ;;  %vm1405_vm12 = vcmp.eq.f32.partialorder %v1404_v52, 8.507059e+37 }
 0x350   : > { %v1369_v4 = vadd.f32 %v2759_v9, %v1368_v56  ;;  %v1353_v27 = vmul.f32 %v2761_v18, %v1352_v23  ;;  %2342 = vrot.lane.b32.xlu1 %v3231_v8, %s2816_s9 }
 0x352   : > { %v1373_v13 = vsel %vm1372_vm4, %v2759_v9, %v1369_v4  ;;  %v1354_v7 = vadd.f32 %v2761_v18, %v1353_v27 }
 0x353   : > { %v2763_v16 = vpop.eup %2762  ;;  %v1378_v10 = vsel %vm1375_vm5, %v1377_v19, %v1373_v13 }
 0x354   : > { %v1358_v53 = vsel %vm1357_vm7, %v2761_v18, %v1354_v7  ;;  %v1396_v57 = vmul.f32 %v2763_v16, %v1313_v31  ;;  %v3494_v36 = vmul.f32 %v3383_v44, %v1378_v10  ;;  %vm1401_vm9 = vweird.f32 %v2763_v16 }
 0x355   : > { %v1363_v42 = vsel %vm1360_vm8, %v1362_v32, %v1358_v53  ;;  %vm1402_vm11 = vmor %vm1400_vm10, %vm1401_vm9 }
 0x356   : > { %v1397_v60 = vsub.f32 1.0, %v1396_v57  ;;  %2612 = vmatmul.msk.f32.vlgmr.msra.gmra.mxu3 %vm452_vm0, %v3494_v36  ;;  %v3499_v8 = vmul.f32 %v3388_v51, %v1363_v42 }
 0x357   : > { %2623 = vmatpush.xpose.msk.msra.mxu3 %vm452_vm0, %v3302_v6 }
 0x358   : > { %v1398_v48 = vmul.f32 %v2763_v16, %v1397_v60  ;;  %2610 = vmatmul.msk.f32.vlgmr.msra.gmra.mxu2 %vm452_vm0, %v3499_v8  ;;  %2414 = vrot.lane.b32.xlu1 %v3281_v35, %s2816_s9 }
 0x359   : > { %2621 = vmatpush.xpose.msk.msra.mxu2 %vm452_vm0, %v3361_v20 }
 0x35a   : > { %v1399_v44 = vadd.f32 %v2763_v16, %v1398_v48  ;;  %v1316_v51 = vpop.xlane.xlu1 %1315 }
 0x35b   : > { %2764 = vrcp.f32 %v1316_v51  ;;  %v1421_v61 = vand.u32 2147483648, %v1316_v51  ;;  %v1419_v5 = vand.u32 2147483647, %v1316_v51  ;;  %vm1415_vm14 = vweird.f32 %v1316_v51 }
 0x35c   : > { %v1403_v55 = vsel %vm1402_vm11, %v2763_v16, %v1399_v44 }
 0x35d   : > { %v1408_v6 = vsel %vm1405_vm12, %v1407_v54, %v1403_v55  ;;  %v1422_v25 = vor.u32 1.1754944e-38, %v1421_v61  ;;  %vm1420_vm1 = vcmp.eq.f32.partialorder %v1419_v5, 8.507059e+37 }
 0x35e   : > { %v3510_v45 = vmul.f32 %v3392_v40, %v1408_v6 }
 0x360   : > { %2616 = vmatmul.msk.f32.vlgmr.msrb.gmra.mxu2 %vm452_vm0, %v3510_v45 }
 0x361   : > { %v2765_v11 = vpop.eup %2764  ;;  %2627 = vmatpush.xpose.msk.msrb.mxu2 %vm452_vm0, %v3377_v34 }
 0x362   : > { %v1411_v35 = vmul.f32 %v2765_v11, %v1316_v51  ;;  %v1310_v20 = vpop.xlane.xlu2 %1309  ;;  %vm1416_vm13 = vweird.f32 %v2765_v11 }
 0x363   : > { %2766 = vrcp.f32 %v1310_v20  ;;  %vm1417_vm15 = vmor %vm1415_vm14, %vm1416_vm13  ;;  %v1389_v2 = vand.u32 2147483647, %v1310_v20  ;;  %v1391_v4 = vand.u32 2147483648, %v1310_v20  ;;  %vm1385_vm3 = vweird.f32 %v1310_v20 }
 0x364   : > { %v1412_v14 = vsub.f32 1.0, %v1411_v35  ;;  %v1322_v46 = vpop.xlane.xlu0 %1321 }
 0x365   : > { %2768 = vrcp.f32 %v1322_v46  ;;  %v1451_v13 = vand.u32 2147483648, %v1322_v46  ;;  %v1449_v10 = vand.u32 2147483647, %v1322_v46  ;;  %vm1390_vm6 = vcmp.eq.f32.partialorder %v1389_v2, 8.507059e+37 }
 0x366   : > { %v1413_v9 = vmul.f32 %v2765_v11, %v1412_v14  ;;  %vm1445_vm7 = vweird.f32 %v1322_v46 }
 0x367   : > { %v1452_v48 = vor.u32 1.1754944e-38, %v1451_v13  ;;  %vm1450_vm9 = vcmp.eq.f32.partialorder %v1449_v10, 8.507059e+37 }
 0x368   : > { %v1414_v18 = vadd.f32 %v2765_v11, %v1413_v9 }
 0x369   : > { %v2767_v40 = vpop.eup %2766 }
 0x36a   : > { %v1418_v49 = vsel %vm1417_vm15, %v2765_v11, %v1414_v18  ;;  %v1381_v31 = vmul.f32 %v2767_v40, %v1310_v20  ;;  %v1319_v15 = vpop.xlane.xlu1 %1318  ;;  %vm1386_vm2 = vweird.f32 %v2767_v40 }
 0x36b   : > { %v2769_v34 = vpop.eup %2768  ;;  %v1423_v56 = vsel %vm1420_vm1, %v1422_v25, %v1418_v49  ;;  %2770 = vrcp.f32 %v1319_v15  ;;  %vm1387_vm5 = vmor %vm1385_vm3, %vm1386_vm2  ;;  %v1436_v35 = vand.u32 2147483648, %v1319_v15  ;;  %vm1430_vm11 = vweird.f32 %v1319_v15 }
 0x36c   : > { %v1382_v63 = vsub.f32 1.0, %v1381_v31  ;;  %v1441_v23 = vmul.f32 %v2769_v34, %v1322_v46  ;;  %v3517_v27 = vmul.f32 %v3398_v1, %v1423_v56  ;;  %vm1446_vm4 = vweird.f32 %v2769_v34 }
 0x36d   : > { %v1392_v1 = vor.u32 1.1754944e-38, %v1391_v4  ;;  %vm1447_vm8 = vmor %vm1445_vm7, %vm1446_vm4  ;;  %v1437_v9 = vor.u32 1.1754944e-38, %v1436_v35 }
 0x36e   : > { %v1383_v26 = vmul.f32 %v2767_v40, %v1382_v63  ;;  %v1442_v19 = vsub.f32 1.0, %v1441_v23  ;;  %2618 = vmatmul.msk.f32.vlgmr.msrb.gmra.mxu3 %vm452_vm0, %v3517_v27 }
 0x36f   : > { %2629 = vmatpush.xpose.msk.msrb.mxu3 %vm452_vm0, %v3359_v17 }
 0x370   : > { %v1384_v7 = vadd.f32 %v2767_v40, %v1383_v26  ;;  %v1443_v16 = vmul.f32 %v2769_v34, %v1442_v19 }
 0x371   : > { %v2771_v32 = vpop.eup %2770 }
 0x372   : > { %v1388_v53 = vsel %vm1387_vm5, %v2767_v40, %v1384_v7  ;;  %v1444_v57 = vadd.f32 %v2769_v34, %v1443_v16  ;;  %v1426_v42 = vmul.f32 %v2771_v32, %v1319_v15  ;;  %v1328_v60 = vpop.xlane.xlu1 %1327  ;;  %vm1431_vm10 = vweird.f32 %v2771_v32 }
 0x373   : > { %v1393_v47 = vsel %vm1390_vm6, %v1392_v1, %v1388_v53  ;;  %2772 = vrcp.f32 %v1328_v60  ;;  %vm1432_vm12 = vmor %vm1430_vm11, %vm1431_vm10  ;;  %v1481_v49 = vand.u32 2147483648, %v1328_v60  ;;  %v1479_v31 = vand.u32 2147483647, %v1328_v60 }
 0x374   : > { %v1448_v52 = vsel %vm1447_vm8, %v2769_v34, %v1444_v57  ;;  %v1427_v44 = vsub.f32 1.0, %v1426_v42  ;;  %v3523_v51 = vpop.xlane.xlu2 %1339  ;;  %v3526_v17 = vmul.f32 %v3404_v39, %v1393_v47  ;;  %v1434_v39 = vand.u32 2147483647, %v1319_v15 }
 0x375   : > { %v1453_v54 = vsel %vm1450_vm9, %v1452_v48, %v1448_v52  ;;  %2774 = vrcp.f32 %v3523_v51  ;;  %vm1475_vm15 = vweird.f32 %v1328_v60  ;;  %v1482_v23 = vor.u32 1.1754944e-38, %v1481_v49 }
 0x376   : > { %v1428_v55 = vmul.f32 %v2771_v32, %v1427_v44  ;;  %2614 = vmatmul.msk.f32.vlgmr.msrb.gmra.mxu1 %vm452_vm0, %v3526_v17  ;;  %v3534_v6 = vmul.f32 %v3408_v30, %v1453_v54  ;;  %vm1435_vm13 = vcmp.eq.f32.partialorder %v1434_v39, 8.507059e+37  ;;  %vm1480_vm2 = vcmp.eq.f32.partialorder %v1479_v31, 8.507059e+37 }
 0x377   : > { %2625 = vmatpush.xpose.msk.msrb.mxu1 %vm452_vm0, %v3371_v24  ;;  %vm1535_vm6 = vweird.f32 %v3523_v51 }
 0x378   : > { %v1429_v11 = vadd.f32 %v2771_v32, %v1428_v55  ;;  %2622 = vmatmul.msk.f32.vlgmr.msra.gmra.mxu2 %vm452_vm0, %v3534_v6 }
 0x379   : > { %v2773_v20 = vpop.eup %2772  ;;  %2633 = vmatpush.xpose.msk.msra.mxu2 %vm452_vm0, %v3369_v22 }
 0x37a   : > { %v1471_v14 = vmul.f32 %v2773_v20, %v1328_v60  ;;  %v1337_v46 = vpop.xlane.xlu0 %1336  ;;  %v3540_v61 = vpop.xlane.xlu1 %1330  ;;  %v1433_v24 = vsel %vm1432_vm12, %v2771_v32, %v1429_v11  ;;  %vm1476_vm14 = vweird.f32 %v2773_v20 }
 0x37b   : > { %2776 = vrcp.f32 %v1337_v46  ;;  %v3542_v30 = vpop.eup %2774  ;;  %v1438_v40 = vsel %vm1435_vm13, %v1437_v9, %v1433_v24  ;;  %vm1477_vm1 = vmor %vm1475_vm15, %vm1476_vm14  ;;  %vm1520_vm3 = vweird.f32 %v1337_v46  ;;  %v1524_v10 = vand.u32 2147483647, %v1337_v46 }
 0x37c   : > { %v1472_v5 = vsub.f32 1.0, %v1471_v14  ;;  %v3544_v18 = vpop.xlane.xlu2 %1348  ;;  %2778 = vrcp.f32 %v3540_v61  ;;  %v1531_v22 = vmul.f32 %v3542_v30, %v3523_v51  ;;  %v3551_v56 = vmul.f32 %v3413_v59, %v1438_v40 }
 0x37d   : > { %2780 = vrcp.f32 %v3544_v18  ;;  %v1526_v1 = vand.u32 2147483648, %v1337_v46  ;;  %v1494_v42 = vand.u32 2147483647, %v3540_v61  ;;  %v1496_v60 = vand.u32 2147483648, %v3540_v61 }
 0x37e   : > { %v1473_v25 = vmul.f32 %v2773_v20, %v1472_v5  ;;  %v1532_v19 = vsub.f32 1.0, %v1531_v22  ;;  %2620 = vmatmul.msk.f32.vlgmr.msra.gmra.mxu1 %vm452_vm0, %v3551_v56  ;;  %vm1536_vm7 = vweird.f32 %v3542_v30  ;;  %vm1525_vm9 = vcmp.eq.f32.partialorder %v1524_v10, 8.507059e+37 }
 0x37f   : > { %2631 = vmatpush.xpose.msk.msra.mxu1 %vm452_vm0, %v3375_v29  ;;  %vm1490_vm10 = vweird.f32 %v3540_v61  ;;  %v1527_v55 = vor.u32 1.1754944e-38, %v1526_v1  ;;  %vm1495_vm12 = vcmp.eq.f32.partialorder %v1494_v42, 8.507059e+37  ;;  %v1497_v39 = vor.u32 1.1754944e-38, %v1496_v60  ;;  %vm3597_vm14 = vmor %vm1535_vm6, %vm1536_vm7 }
 0x380   : > { %v1474_v15 = vadd.f32 %v2773_v20, %v1473_v25  ;;  %v1533_v57 = vmul.f32 %v3542_v30, %v1532_v19  ;;  %v1539_v9 = vand.u32 2147483647, %v3523_v51  ;;  %v1541_v5 = vand.u32 2147483648, %v3523_v51 }
 0x381   : > { %v2777_v34 = vpop.eup %2776  ;;  %v1586_v1 = vand.u32 2147483648, %v3544_v18 }
 0x382   : > { %v1478_v63 = vsel %vm1477_vm1, %v2773_v20, %v1474_v15  ;;  %v1516_v2 = vmul.f32 %v2777_v34, %v1337_v46  ;;  %v3553_v4 = vpop.xlane.xlu1 %1324  ;;  %v2779_v26 = vpop.eup %2778  ;;  %vm1521_vm4 = vweird.f32 %v2777_v34  ;;  %v1534_v20 = vadd.f32 %v3542_v30, %v1533_v57 }
 0x383   : > { %2782 = vrcp.f32 %v3553_v4  ;;  %v1483_v13 = vsel %vm1480_vm2, %v1482_v23, %v1478_v63  ;;  %v1486_v16 = vmul.f32 %v2779_v26, %v3540_v61  ;;  %v3561_v59 = vpop.eup %2780  ;;  %vm1491_vm5 = vweird.f32 %v2779_v26  ;;  %vm1522_vm8 = vmor %vm1520_vm3, %vm1521_vm4 }
 0x384   : > { %v1517_v7 = vsub.f32 1.0, %v1516_v2  ;;  %v3567_v47 = vmul.f32 %v3420_v62, %v1483_v13  ;;  %v1576_v29 = vmul.f32 %v3561_v59, %v3544_v18  ;;  %vm1492_vm11 = vmor %vm1490_vm10, %vm1491_vm5  ;;  %v1466_v25 = vand.u32 2147483648, %v3553_v4  ;;  %v3587_v49 = vpop.permute.xlu2 %2126 }
 0x385   : > { %v1487_v53 = vsub.f32 1.0, %v1486_v16  ;;  %v1464_v22 = vand.u32 2147483647, %v3553_v4  ;;  %v1538_v63 = vsel %vm3597_vm14, %v3542_v30, %v1534_v20  ;;  %vm1460_vm15 = vweird.f32 %v3553_v4 }
 0x386   : > { %v1518_v32 = vmul.f32 %v2777_v34, %v1517_v7  ;;  %2626 = vmatmul.msk.f32.vlgmr.msrb.gmra.mxu1 %vm452_vm0, %v3567_v47  ;;  %v1577_v61 = vsub.f32 1.0, %v1576_v29  ;;  %v1542_v51 = vor.u32 1.1754944e-38, %v1541_v5  ;;  %vm1540_vm2 = vcmp.eq.f32.partialorder %v1539_v9, 8.507059e+37 }
 0x387   : > { %v1488_v52 = vmul.f32 %v2779_v26, %v1487_v53  ;;  %2637 = vmatpush.xpose.msk.msrb.mxu1 %vm452_vm0, %v3485_v3  ;;  %vm1465_vm3 = vcmp.eq.f32.partialorder %v1464_v22, 8.507059e+37  ;;  %vm1581_vm4 = vweird.f32 %v3561_v59  ;;  %vm1580_vm5 = vweird.f32 %v3544_v18 }
 0x388   : > { %v1519_v48 = vadd.f32 %v2777_v34, %v1518_v32  ;;  %v1578_v23 = vmul.f32 %v3561_v59, %v1577_v61  ;;  %v1543_v7 = vsel %vm1540_vm2, %v1542_v51, %v1538_v63  ;;  %v1584_v32 = vand.u32 2147483647, %v3544_v18  ;;  %vm3632_vm7 = vmor %vm1580_vm5, %vm1581_vm4 }
 0x389   : > { %v2783_v44 = vpop.eup %2782  ;;  %v1489_v62 = vadd.f32 %v2779_v26, %v1488_v52  ;;  %v3630_v60 = vmul.f32 %v3426_v21, %v1543_v7  ;;  %v1587_v29 = vor.u32 1.1754944e-38, %v1586_v1 }
 0x38a   : > { %v1523_v54 = vsel %vm1522_vm8, %v2777_v34, %v1519_v48  ;;  %v1456_v11 = vmul.f32 %v2783_v44, %v3553_v4  ;;  %v3576_v35 = vpop.xlane.xlu1 %1333  ;;  %vm1461_vm13 = vweird.f32 %v2783_v44  ;;  %v1579_v4 = vadd.f32 %v3561_v59, %v1578_v23 }
 0x38b   : > { %2784 = vrcp.f32 %v3576_v35  ;;  %v1528_v14 = vsel %vm1525_vm9, %v1527_v55, %v1523_v54  ;;  %v1493_v46 = vsel %vm1492_vm11, %v2779_v26, %v1489_v62  ;;  %vm1462_vm1 = vmor %vm1460_vm15, %vm1461_vm13  ;;  %v1467_v26 = vor.u32 1.1754944e-38, %v1466_v25 }
 0x38c   : > { %v1457_v24 = vsub.f32 1.0, %v1456_v11  ;;  %v1498_v40 = vsel %vm1495_vm12, %v1497_v39, %v1493_v46  ;;  %v3602_v34 = vmul.f32 %v3432_v50, %v1528_v14  ;;  %v1511_v53 = vand.u32 2147483648, %v3576_v35  ;;  %v3636_v48 = vpop.permute.xlu2 %2174 }
 0x38d   : > { %v3591_v15 = vmul.f32 %v3430_v12, %v1498_v40  ;;  %v2079_v19 = vpop.permute.xlu0 %2078  ;;  %v1509_v42 = vand.u32 2147483647, %v3576_v35  ;;  %v1583_v18 = vsel %vm3632_vm7, %v3561_v59, %v1579_v4  ;;  %vm1505_vm8 = vweird.f32 %v3576_v35 }
 0x38e   : > { %v1458_v31 = vmul.f32 %v2783_v44, %v1457_v24  ;;  %2632 = vmatmul.msk.f32.vlgmr.msra.gmra.mxu1 %vm452_vm0, %v3602_v34  ;;  %vm1585_vm10 = vcmp.eq.f32.partialorder %v1584_v32, 8.507059e+37 }
 0x38f   : > { %2628 = vmatmul.msk.f32.vlgmr.msrb.gmra.mxu2 %vm452_vm0, %v3591_v15  ;;  %2643 = vmatpush.xpose.msk.msra.mxu1 %vm452_vm0, %v2079_v19  ;;  %vm1510_vm11 = vcmp.eq.f32.partialorder %v1509_v42, 8.507059e+37 }
 0x390   : > { %v1459_v2 = vadd.f32 %v2783_v44, %v1458_v31  ;;  %2639 = vmatpush.xpose.msk.msrb.mxu2 %vm452_vm0, %v3379_v38 }
 0x391   : > { %v2785_v12 = vpop.eup %2784 }
 0x392   : > { %v1463_v50 = vsel %vm1462_vm1, %v2783_v44, %v1459_v2  ;;  %v1501_v30 = vmul.f32 %v2785_v12, %v3576_v35  ;;  %v1346_v13 = vpop.xlane.xlu1 %1345  ;;  %vm1506_vm6 = vweird.f32 %v2785_v12  ;;  %v1512_v44 = vor.u32 1.1754944e-38, %v1511_v53 }
 0x393   : > { %v1468_v16 = vsel %vm1465_vm3, %v1467_v26, %v1463_v50  ;;  %2786 = vrcp.f32 %v1346_v13  ;;  %vm1507_vm9 = vmor %vm1505_vm8, %vm1506_vm6  ;;  %v1571_v35 = vand.u32 2147483648, %v1346_v13  ;;  %v1569_v14 = vand.u32 2147483647, %v1346_v13 }
 0x394   : > { %v1502_v10 = vsub.f32 1.0, %v1501_v30  ;;  %v3620_v38 = vmul.f32 %v3443_v43, %v1468_v16  ;;  %vm1565_vm13 = vweird.f32 %v1346_v13  ;;  %v2151_v9 = vpop.permute.xlu2 %2150 }
 0x395   : > { %v1572_v24 = vor.u32 1.1754944e-38, %v1571_v35  ;;  %vm1570_vm15 = vcmp.eq.f32.partialorder %v1569_v14, 8.507059e+37  ;;  %v2199_v23 = vpop.permute.xlu0 %2198 }
 0x396   : > { %v1503_v57 = vmul.f32 %v2785_v12, %v1502_v10  ;;  %2624 = vmatmul.msk.f32.vlgmr.msra.gmra.mxu3 %vm452_vm0, %v3620_v38 }
 0x397   : > { %2635 = vmatpush.xpose.msk.msra.mxu3 %vm452_vm0, %v3373_v28  ;;  %2634 = vmatmul.msk.f32.vlgmr.msra.gmra.mxu2 %vm452_vm0, %v3630_v60  ;;  %v1588_v28 = vsel %vm1585_vm10, %v1587_v29, %v1583_v18 }
 0x398   : > { %v1504_v52 = vadd.f32 %v2785_v12, %v1503_v57  ;;  %v3652_v46 = vmul.f32 %v3439_v41, %v1588_v28 }
 0x399   : > { %v2787_v21 = vpop.eup %2786 }
 0x39a   : > { %v1508_v54 = vsel %vm1507_vm9, %v2785_v12, %v1504_v52  ;;  %v1561_v55 = vmul.f32 %v2787_v21, %v1346_v13  ;;  %v1343_v62 = vpop.xlane.xlu1 %1342  ;;  %vm1566_vm12 = vweird.f32 %v2787_v21 }
 0x39b   : > { %v1513_v11 = vsel %vm1510_vm11, %v1512_v44, %v1508_v54  ;;  %2788 = vrcp.f32 %v1343_v62  ;;  %vm1567_vm14 = vmor %vm1565_vm13, %vm1566_vm12  ;;  %v1556_v22 = vand.u32 2147483648, %v1343_v62  ;;  %vm1550_vm2 = vweird.f32 %v1343_v62 }
 0x39c   : > { %v1562_v20 = vsub.f32 1.0, %v1561_v55  ;;  %v3647_v59 = vmul.f32 %v3448_v33, %v1513_v11  ;;  %v2223_v26 = vpop.permute.xlu2 %2222 }
 0x39d   : > { %v1557_v2 = vor.u32 1.1754944e-38, %v1556_v22  ;;  %v2247_v50 = vpop.permute.xlu0 %2246 }
 0x39e   : > { %v1563_v39 = vmul.f32 %v2787_v21, %v1562_v20  ;;  %2630 = vmatmul.msk.f32.vlgmr.msrb.gmra.mxu3 %vm452_vm0, %v3647_v59 }
 0x39f   : > { %2641 = vmatpush.xpose.msk.msrb.mxu3 %vm452_vm0, %v3477_v37  ;;  %2640 = vmatmul.msk.f32.vlgmr.msrb.gmra.mxu2 %vm452_vm0, %v3652_v46  ;;  %v1554_v37 = vand.u32 2147483647, %v1343_v62 }
 0x3a0   : > { %v1564_v61 = vadd.f32 %v2787_v21, %v1563_v39 }
 0x3a1   : > { %v2789_v33 = vpop.eup %2788  ;;  %vm1555_vm4 = vcmp.eq.f32.partialorder %v1554_v37, 8.507059e+37 }
 0x3a2   : > { %v1568_v5 = vsel %vm1567_vm14, %v2787_v21, %v1564_v61  ;;  %v1546_v40 = vmul.f32 %v2789_v33, %v1343_v62  ;;  %vm1551_vm1 = vweird.f32 %v2789_v33 }
 0x3a3   : > { %v1573_v25 = vsel %vm1570_vm15, %v1572_v24, %v1568_v5  ;;  %vm1552_vm3 = vmor %vm1550_vm2, %vm1551_vm1 }
 0x3a4   : > { %v1547_v31 = vsub.f32 1.0, %v1546_v40  ;;  %v1574_v41 = vmul.f32 %v3453_v58, %v1573_v25  ;;  %v2295_v30 = vpop.permute.xlu2 %2294 }
 0x3a6   : > { %v1548_v3 = vmul.f32 %v2789_v33, %v1547_v31  ;;  %2638 = vmatmul.msk.f32.vlgmr.msrb.gmra.mxu1 %vm452_vm0, %v1574_v41 }
 0x3a7   : > { %2649 = vmatpush.xpose.msk.msrb.mxu1 %vm452_vm0, %v2151_v9 }
 0x3a8   : > { %v1549_v63 = vadd.f32 %v2789_v33, %v1548_v3 }
 0x3aa   : > { %v1553_v12 = vsel %vm1552_vm3, %v2789_v33, %v1549_v63 }
 0x3ab   : > { %v1558_v51 = vsel %vm1555_vm4, %v1557_v2, %v1553_v12 }
 0x3ac   : > { %v1559_v19 = vmul.f32 %v3461_v0, %v1558_v51 }
 0x3ae   : > { %2636 = vmatmul.msk.f32.vlgmr.msra.gmra.mxu3 %vm452_vm0, %v1559_v19  ;;  %2644 = vmatmul.msk.f32.vlgmr.msra.gmra.mxu1 %vm452_vm0, %v3494_v36  ;;  %v2319_v36 = vpop.permute.xlu0 %2318 }
 0x3af   : > { %2647 = vmatpush.xpose.msk.msra.mxu3 %vm452_vm0, %v3587_v49  ;;  %2655 = vmatpush.xpose.msk.msra.mxu1 %vm452_vm0, %v2223_v26 }
 0x3b2   : > { %v2103_v58 = vpop.permute.xlu1 %2102 }
 0x3b3   : > { %2645 = vmatpush.xpose.msk.msra.mxu2 %vm452_vm0, %v2103_v58 }
 0x3b6   : > { %2642 = vmatmul.msk.f32.vlgmr.msrb.gmra.mxu3 %vm452_vm0, %v3499_v8  ;;  %2646 = vmatmul.msk.f32.vlgmr.msra.gmra.mxu2 %vm452_vm0, %v3526_v17  ;;  %v2367_v8 = vpop.permute.xlu2 %2366 }
 0x3b7   : > { %2651 = vmatpush.xpose.msk.msrb.mxu2 %vm452_vm0, %v3636_v48  ;;  %2650 = vmatmul.msk.f32.vlgmr.msrb.gmra.mxu1 %vm452_vm0, %v3517_v27 }
 0x3b8   : > { %2653 = vmatpush.xpose.msk.msrb.mxu3 %vm452_vm0, %v2199_v23  ;;  %2661 = vmatpush.xpose.msk.msrb.mxu1 %vm452_vm0, %v2295_v30 }
 0x3ba   : > { %v2271_v0 = vpop.permute.xlu1 %2270 }
 0x3bb   : > { %2657 = vmatpush.xpose.msk.msra.mxu2 %vm452_vm0, %v2247_v50 }
 0x3be   : > { %2648 = vmatmul.msk.f32.vlgmr.msra.gmra.mxu3 %vm452_vm0, %v3510_v45  ;;  %2652 = vmatmul.msk.f32.vlgmr.msrb.gmra.mxu2 %vm452_vm0, %v3551_v56  ;;  %v2391_v45 = vpop.permute.xlu0 %2390 }
 0x3bf   : > { %2656 = vmatmul.msk.f32.vlgmr.msra.gmra.mxu1 %vm452_vm0, %v3620_v38  ;;  %2659 = vmatpush.xpose.msk.msra.mxu3 %vm452_vm0, %v2271_v0 }
 0x3c0   : > { %2663 = vmatpush.xpose.msk.msrb.mxu2 %vm452_vm0, %v2319_v36  ;;  %2667 = vmatpush.xpose.msk.msra.mxu1 %vm452_vm0, %v2367_v8 }
 0x3c2   : > { %v2343_v27 = vpop.permute.xlu1 %2342 }
 0x3c6   : > { %2654 = vmatmul.msk.f32.vlgmr.msrb.gmra.mxu3 %vm452_vm0, %v3534_v6  ;;  %2658 = vmatmul.msk.f32.vlgmr.msra.gmra.mxu2 %vm452_vm0, %v3567_v47 }
 0x3c7   : > { %2662 = vmatmul.msk.f32.vlgmr.msrb.gmra.mxu1 %vm452_vm0, %v3647_v59  ;;  %2665 = vmatpush.xpose.msk.msrb.mxu3 %vm452_vm0, %v2343_v27 }
 0x3c8   : > { %2669 = vmatpush.xpose.msk.msra.mxu2 %vm452_vm0, %v2391_v45 }
 0x3ca   : > { %v2415_v17 = vpop.permute.xlu1 %2414 }
 0x3ce   : > { %2660 = vmatmul.msk.f32.vlgmr.msra.gmra.mxu3 %vm452_vm0, %v3591_v15  ;;  %2664 = vmatmul.msk.f32.vlgmr.msrb.gmra.mxu2 %vm452_vm0, %v3602_v34 }
 0x3cf   : > { %2668 = vmatmul.msk.f32.vlgmr.msra.gmra.mxu1 %vm452_vm0, %v1559_v19  ;;  %2671 = vmatpush.xpose.msk.msra.mxu3 %vm452_vm0, %v2415_v17 }
 0x3d6   : > { %2666 = vmatmul.msk.f32.vlgmr.msrb.gmra.mxu3 %vm452_vm0, %v3630_v60  ;;  %2670 = vmatmul.msk.f32.vlgmr.msra.gmra.mxu2 %vm452_vm0, %v1574_v41 }
 0x3d9   : > { %v1643_v6 = vpop.f32.mrf.mxu3 }
 0x3da   : > { %2039 = vst.msk [vmem:[%s3711_s15 + $0x10] sm:$0xff] %vm452_vm0, %v1643_v6 }
 0x3db   : > { %v1615_v56 = vpop.f32.mrf.mxu2 }
 0x3dc   : > { %2038 = vst.msk [vmem:[%s3711_s15] sm:$0xff] %vm452_vm0, %v1615_v56 }
 0x3de   : > { %2672 = vmatmul.msk.f32.vlgmr.msra.gmra.mxu3 %vm452_vm0, %v3652_v46 }
 0x3e3   : > { %v1699_v47 = vpop.f32.mrf.mxu2 }
 0x3e4   : > { %2041 = vst.msk [vmem:[%s3711_s15 + $0x30] sm:$0xff] %vm452_vm0, %v1699_v47 }
 0x3f1   : > { %v1727_v49 = vpop.f32.mrf.mxu3 }
 0x3f2   : > { %2042 = vst.msk [vmem:[%s3711_s15 + $0x40] sm:$0xff] %vm452_vm0, %v1727_v49 }
 0x3f3   : > { %v1671_v15 = vpop.f32.mrf.mxu1 }
 0x3f4   : > { %2040 = vst.msk [vmem:[%s3711_s15 + $0x20] sm:$0xff] %vm452_vm0, %v1671_v15 }
 0x3fb   : > { %v1783_v34 = vpop.f32.mrf.mxu2  ;;  %v1755_v13 = vpop.f32.mrf.mxu1 }
 0x3fc   : > { %2044 = vst.msk [vmem:[%s3711_s15 + $0x60] sm:$0xff] %vm452_vm0, %v1783_v34 }
 0x3fd   : > { %2043 = vst.msk [vmem:[%s3711_s15 + $0x50] sm:$0xff] %vm452_vm0, %v1755_v13 }
 0x403   : > { %v1839_v7 = vpop.f32.mrf.mxu1 }
 0x404   : > { %2046 = vst.msk [vmem:[%s3711_s15 + $0x80] sm:$0xff] %vm452_vm0, %v1839_v7 }
 0x40b   : > { %v1923_v16 = vpop.f32.mrf.mxu1 }
 0x40c   : > { %2049 = vst.msk [vmem:[%s3711_s15 + $0xb0] sm:$0xff] %vm452_vm0, %v1923_v16 }
 0x412   : > { %v1867_v4 = vpop.f32.mrf.mxu2 }
 0x413   : > { %2047 = vst.msk [vmem:[%s3711_s15 + $0x90] sm:$0xff] %vm452_vm0, %v1867_v4 }
 0x419   : > { %v1811_v10 = vpop.f32.mrf.mxu3 }
 0x41a   : > { %2045 = vst.msk [vmem:[%s3711_s15 + $0x70] sm:$0xff] %vm452_vm0, %v1811_v10  ;;  %v1951_v38 = vpop.f32.mrf.mxu2 }
 0x41b   : > { %2050 = vst.msk [vmem:[%s3711_s15 + $0xc0] sm:$0xff] %vm452_vm0, %v1951_v38 }
 0x421   : > { %v1895_v32 = vpop.f32.mrf.mxu3 }
 0x422   : > { %2048 = vst.msk [vmem:[%s3711_s15 + $0xa0] sm:$0xff] %vm452_vm0, %v1895_v32  ;;  %v2035_v1 = vpop.f32.mrf.mxu2 }
 0x423   : > { %v2007_v53 = vpop.f32.mrf.mxu1  ;;  %2053 = vst.msk [vmem:[%s3711_s15 + $0xf0] sm:$0xff] %vm452_vm0, %v2035_v1 }
 0x424   : > { %2052 = vst.msk [vmem:[%s3711_s15 + $0xe0] sm:$0xff] %vm452_vm0, %v2007_v53 }
 0x42b   : > { %v2099_v57 = vpop.f32.mrf.mxu1 }
 0x42c   : > { %2674 = vst.msk [vmem:[%s3711_s15 + $0x18] sm:$0xff] %vm452_vm0, %v2099_v57 }
 0x431   : > { %v1979_v42 = vpop.f32.mrf.mxu3 }
 0x432   : > { %2051 = vst.msk [vmem:[%s3711_s15 + $0xd0] sm:$0xff] %vm452_vm0, %v1979_v42 }
 0x434   : > { %v2171_v60 = vpop.f32.mrf.mxu1 }
 0x435   : > { %2677 = vst.msk [vmem:[%s3711_s15 + $0x48] sm:$0xff] %vm452_vm0, %v2171_v60 }
 0x439   : > { %v2075_v43 = vpop.f32.mrf.mxu3  ;;  %v2123_v48 = vpop.f32.mrf.mxu2 }
 0x43a   : > { %2673 = vst.msk [vmem:[%s3711_s15 + $0x8] sm:$0xff] %vm452_vm0, %v2075_v43 }
 0x43b   : > { %2675 = vst.msk [vmem:[%s3711_s15 + $0x28] sm:$0xff] %vm452_vm0, %v2123_v48 }
 0x43c   : > { %v2243_v18 = vpop.f32.mrf.mxu1 }
 0x43d   : > { %2680 = vst.msk [vmem:[%s3711_s15 + $0x78] sm:$0xff] %vm452_vm0, %v2243_v18 }
 0x441   : > { %v2147_v52 = vpop.f32.mrf.mxu3  ;;  %v2195_v21 = vpop.f32.mrf.mxu2 }
 0x442   : > { %2676 = vst.msk [vmem:[%s3711_s15 + $0x38] sm:$0xff] %vm452_vm0, %v2147_v52 }
 0x443   : > { %2678 = vst.msk [vmem:[%s3711_s15 + $0x58] sm:$0xff] %vm452_vm0, %v2195_v21 }
 0x444   : > { %v2315_v29 = vpop.f32.mrf.mxu1 }
 0x445   : > { %2683 = vst.msk [vmem:[%s3711_s15 + $0xa8] sm:$0xff] %vm452_vm0, %v2315_v29 }
 0x449   : > { %v2219_v44 = vpop.f32.mrf.mxu3  ;;  %v2267_v54 = vpop.f32.mrf.mxu2 }
 0x44a   : > { %2679 = vst.msk [vmem:[%s3711_s15 + $0x68] sm:$0xff] %vm452_vm0, %v2219_v44 }
 0x44b   : > { %2681 = vst.msk [vmem:[%s3711_s15 + $0x88] sm:$0xff] %vm452_vm0, %v2267_v54 }
 0x44c   : > { %v2387_v55 = vpop.f32.mrf.mxu1 }
 0x44d   : > { %2686 = vst.msk [vmem:[%s3711_s15 + $0xd8] sm:$0xff] %vm452_vm0, %v2387_v55 }
 0x451   : > { %v2291_v62 = vpop.f32.mrf.mxu3  ;;  %v2339_v28 = vpop.f32.mrf.mxu2 }
 0x452   : > { %2682 = vst.msk [vmem:[%s3711_s15 + $0x98] sm:$0xff] %vm452_vm0, %v2291_v62 }
 0x453   : > { %2684 = vst.msk [vmem:[%s3711_s15 + $0xb8] sm:$0xff] %vm452_vm0, %v2339_v28 }
 0x459   : > { %v2363_v11 = vpop.f32.mrf.mxu3  ;;  %v2411_v20 = vpop.f32.mrf.mxu2 }
 0x45a   : > { %2685 = vst.msk [vmem:[%s3711_s15 + $0xc8] sm:$0xff] %vm452_vm0, %v2363_v11 }
 0x45b   : > { %2687 = vst.msk [vmem:[%s3711_s15 + $0xe8] sm:$0xff] %vm452_vm0, %v2411_v20 }
 0x461   : > { %v2435_v59 = vpop.f32.mrf.mxu3 }
 0x462   : > { %2688 = vst.msk [vmem:[%s3711_s15 + $0xf8] sm:$0xff] %vm452_vm0, %v2435_v59 }
 0x463 PF: > { %p10_p9 = scmp.ge.s32.totalorder %s2854_s16, 10   ;;  %s3797_s12 = smov %s2808_s13 }
 0x464   : > { %s3798_s13 = smov %s2863_s19  ;;  %s3799_s14 = smov %s2854_s16 }
 0x465   :  { %12 = sbr.rel (!%p10_p9) target bundleno = 2 (0x2), region = 106 }

</bundles_post_ra>
